<compile_context>
chip_gen: v5e
topology: v5e:2x2
jax: 0.10.0
libtpu: 0.0.40
codegen_flags: <defaults>
</compile_context>

<pallas_src>
import functools

import jax
import jax.numpy as jnp
from jax.experimental import pallas as pl
from jax.experimental.pallas import tpu as pltpu  # noqa: F401  (TPU backend)

EPS = 1e-6
INIT_INV_SOFTPLUS_SIGMA = -3.0
O_PAD = 128   # pad the output-class dim to a full lane width
B_PAD = 8     # pad the batch dim to a full sublane count


# ----------------------------------------------------------------------------
# Fused kernel: sample VI weights in VMEM, then run the 2-layer MLP forward.
# ----------------------------------------------------------------------------
def fused_vi_mlp_kernel(
    x_ref,                                  # (B_PAD, D)
    mu_w1_ref, isp_w1_ref, nz_w1_ref,       # (H, D)      PyTorch Linear (out, in)
    mu_b1_ref, isp_b1_ref, nz_b1_ref,       # (1, H)
    mu_w2_ref, isp_w2_ref, nz_w2_ref,       # (O_PAD, H)  zero-padded rows >= O
    mu_b2_ref, isp_b2_ref, nz_b2_ref,       # (1, O_PAD)  zero-padded lanes >= O
    o_ref,                                  # (B_PAD, O_PAD)
):
    def sample(mu_r, isp_r, nz_r):
        isp = isp_r[...]
        # softplus(x) = log(1 + exp(x)), numerically stable via logaddexp.
        sigma = jnp.logaddexp(isp, jnp.zeros_like(isp)) + EPS
        return mu_r[...] + nz_r[...] * sigma

    w1 = sample(mu_w1_ref, isp_w1_ref, nz_w1_ref)   # (H, D)
    b1 = sample(mu_b1_ref, isp_b1_ref, nz_b1_ref)   # (1, H)
    w2 = sample(mu_w2_ref, isp_w2_ref, nz_w2_ref)   # (O_PAD, H)
    b2 = sample(mu_b2_ref, isp_b2_ref, nz_b2_ref)   # (1, O_PAD)

    # h = relu(x @ W1^T + b1): contract x dim 1 against W1 dim 1 (no transpose).
    h = jax.lax.dot_general(
        x_ref[...], w1,
        dimension_numbers=(((1,), (1,)), ((), ())),
        preferred_element_type=jnp.float32)
    h = jnp.maximum(h + b1, 0.0)

    # y = h @ W2^T + b2 (same NT contraction).
    y = jax.lax.dot_general(
        h, w2,
        dimension_numbers=(((1,), (1,)), ((), ())),
        preferred_element_type=jnp.float32)
    o_ref[...] = y + b2


# ----------------------------------------------------------------------------
# FullVIModel.forward equivalent (glue: slicing the flat VI params, padding).
# ----------------------------------------------------------------------------
def full_vi_forward(x_nchw, mu, inv_softplus_sigma, noise, dims):
    D, H, O = dims
    B = x_nchw.shape[0]
    B_pad = max(B_PAD, ((B + 7) // 8) * 8)
    HD, OH = H * D, O * H

    def unpack(v):
        """Slice a flat vector in set_weights order; pad the OUT dim to O_PAD."""
        off = 0
        w1 = v[off:off + HD].reshape(H, D); off += HD   # Linear1.weight (out, in)
        b1 = v[off:off + H].reshape(1, H);  off += H    # Linear1.bias
        w2 = v[off:off + OH].reshape(O, H); off += OH   # Linear2.weight (out, in)
        b2 = v[off:off + O].reshape(1, O);  off += O    # Linear2.bias
        # Zero mu/noise in the pad region => sampled padded weights are exactly 0.
        w2 = jnp.pad(w2, ((0, O_PAD - O), (0, 0)))
        b2 = jnp.pad(b2, ((0, 0), (0, O_PAD - O)))
        return w1, b1, w2, b2

    mu_p = unpack(mu)
    isp_p = unpack(inv_softplus_sigma)
    nz_p = unpack(noise)

    x_flat = x_nchw.reshape(B, -1).astype(jnp.float32)
    assert x_flat.shape[1] == D
    x_pad = jnp.pad(x_flat, ((0, B_pad - B), (0, 0)))

    # Operand order: x, then (mu, isp, noise) for each of W1, b1, W2, b2.
    operands = (x_pad,) + tuple(p[i] for i in range(4) for p in (mu_p, isp_p, nz_p))

    in_specs = [pl.BlockSpec(op.shape, lambda: (0, 0)) for op in operands]
    out = pl.pallas_call(
        fused_vi_mlp_kernel,
        out_shape=jax.ShapeDtypeStruct((B_pad, O_PAD), jnp.float32),
        in_specs=in_specs,
        out_specs=pl.BlockSpec((B_pad, O_PAD), lambda: (0, 0)),
    )(*operands)

    return out[:B, :O]


if __name__ == "__main__":
    # Small, deterministic example consistent with an NCHW image input.
    B, C, Himg, Wimg = 2, 4, 16, 16
    D = C * Himg * Wimg          # 1024 in-features
    HID = 32                     # hidden units
    OUT = 10                     # output classes
    num_param = HID * D + HID + OUT * HID + OUT   # 33130

    key = jax.random.PRNGKey(0)
    kx, kmu, knoise = jax.random.split(key, 3)

    x = jax.random.normal(kx, (B, C, Himg, Wimg), dtype=jnp.float32)
    # Variational parameters (module __init__ semantics: mu from ptm_w or zeros,
    # inv_softplus_sigma filled with -3.0).  Small random mu keeps outputs nontrivial.
    mu = 0.01 * jax.random.normal(kmu, (num_param,), dtype=jnp.float32)
    inv_softplus_sigma = jnp.full((num_param,), INIT_INV_SOFTPLUS_SIGMA, jnp.float32)
    # Reparameterization noise (torch.randn equivalent), drawn once for determinism.
    noise = jax.random.normal(knoise, (num_param,), dtype=jnp.float32)

    fwd = jax.jit(functools.partial(full_vi_forward, dims=(D, HID, OUT)))
    y = fwd(x, mu, inv_softplus_sigma, noise)
    jax.block_until_ready(y)

    assert y.shape == (B, OUT) and y.dtype == jnp.float32

    # Pure-JAX reference of the module's forward for a sanity check.
    sigma_ref = jax.nn.softplus(inv_softplus_sigma) + EPS
    w = mu + noise * sigma_ref
    off = 0
    w1 = w[off:off + HID * D].reshape(HID, D); off += HID * D
    b1 = w[off:off + HID];                     off += HID
    w2 = w[off:off + OUT * HID].reshape(OUT, HID); off += OUT * HID
    b2 = w[off:off + OUT]
    x_flat = x.reshape(B, -1)
    h_ref = jnp.maximum(
        jnp.dot(x_flat, w1.T, precision=jax.lax.Precision.HIGHEST) + b1, 0.0)
    y_ref = jnp.dot(h_ref, w2.T, precision=jax.lax.Precision.HIGHEST) + b2
    assert bool(jnp.all(jnp.isfinite(y)))
    assert bool(jnp.allclose(y, y_ref, atol=2e-2, rtol=2e-2))

    print("KERNEL_OK")
</pallas_src>

<mosaic_0001>
module attributes {stable_mosaic.version = 11 : i64} {
  func.func @fused_vi_mlp_kernel(%arg0: memref<8x1024xf32, #tpu.memory_space<vmem>>, %arg1: memref<32x1024xf32, #tpu.memory_space<vmem>>, %arg2: memref<32x1024xf32, #tpu.memory_space<vmem>>, %arg3: memref<32x1024xf32, #tpu.memory_space<vmem>>, %arg4: memref<1x32xf32, #tpu.memory_space<vmem>>, %arg5: memref<1x32xf32, #tpu.memory_space<vmem>>, %arg6: memref<1x32xf32, #tpu.memory_space<vmem>>, %arg7: memref<128x32xf32, #tpu.memory_space<vmem>>, %arg8: memref<128x32xf32, #tpu.memory_space<vmem>>, %arg9: memref<128x32xf32, #tpu.memory_space<vmem>>, %arg10: memref<1x128xf32, #tpu.memory_space<vmem>>, %arg11: memref<1x128xf32, #tpu.memory_space<vmem>>, %arg12: memref<1x128xf32, #tpu.memory_space<vmem>>, %arg13: memref<8x128xf32, #tpu.memory_space<vmem>>) attributes {dimension_semantics = [], scalar_prefetch = 0 : i64, scratch_operands = 0 : i64, tpu.core_type = #tpu.core_type<tc>} {
    %c0 = arith.constant 0 : index
    %c0_0 = arith.constant 0 : index
    %0 = vector.load %arg2[%c0, %c0_0] : memref<32x1024xf32, #tpu.memory_space<vmem>>, vector<32x1024xf32>
    %cst = arith.constant 0.000000e+00 : f32
    %1 = vector.broadcast %cst : f32 to vector<32x1024xf32>
    %2 = arith.maximumf %0, %1 : vector<32x1024xf32>
    %3 = arith.subf %0, %1 : vector<32x1024xf32>
    %4 = arith.cmpf one, %3, %3 : vector<32x1024xf32>
    %5 = arith.addf %0, %1 : vector<32x1024xf32>
    %6 = math.absf %3 : vector<32x1024xf32>
    %cst_1 = arith.constant 0.000000e+00 : f32
    %7 = vector.broadcast %cst_1 : f32 to vector<32x1024xf32>
    %8 = arith.subf %7, %6 : vector<32x1024xf32>
    %9 = math.exp %8 : vector<32x1024xf32>
    %10 = math.log1p %9 : vector<32x1024xf32>
    %11 = arith.addf %2, %10 : vector<32x1024xf32>
    %12 = arith.select %4, %5, %11 : vector<32x1024xi1>, vector<32x1024xf32>
    %cst_2 = arith.constant 9.99999997E-7 : f32
    %13 = vector.broadcast %cst_2 : f32 to vector<32x1024xf32>
    %14 = arith.addf %12, %13 : vector<32x1024xf32>
    %c0_3 = arith.constant 0 : index
    %c0_4 = arith.constant 0 : index
    %15 = vector.load %arg1[%c0_3, %c0_4] : memref<32x1024xf32, #tpu.memory_space<vmem>>, vector<32x1024xf32>
    %c0_5 = arith.constant 0 : index
    %c0_6 = arith.constant 0 : index
    %16 = vector.load %arg3[%c0_5, %c0_6] : memref<32x1024xf32, #tpu.memory_space<vmem>>, vector<32x1024xf32>
    %17 = arith.mulf %16, %14 : vector<32x1024xf32>
    %18 = arith.addf %15, %17 : vector<32x1024xf32>
    %c0_7 = arith.constant 0 : index
    %c0_8 = arith.constant 0 : index
    %19 = vector.load %arg5[%c0_7, %c0_8] : memref<1x32xf32, #tpu.memory_space<vmem>>, vector<1x32xf32>
    %cst_9 = arith.constant 0.000000e+00 : f32
    %20 = vector.broadcast %cst_9 : f32 to vector<1x32xf32>
    %21 = arith.maximumf %19, %20 : vector<1x32xf32>
    %22 = arith.subf %19, %20 : vector<1x32xf32>
    %23 = arith.cmpf one, %22, %22 : vector<1x32xf32>
    %24 = arith.addf %19, %20 : vector<1x32xf32>
    %25 = math.absf %22 : vector<1x32xf32>
    %cst_10 = arith.constant 0.000000e+00 : f32
    %26 = vector.broadcast %cst_10 : f32 to vector<1x32xf32>
    %27 = arith.subf %26, %25 : vector<1x32xf32>
    %28 = math.exp %27 : vector<1x32xf32>
    %29 = math.log1p %28 : vector<1x32xf32>
    %30 = arith.addf %21, %29 : vector<1x32xf32>
    %31 = arith.select %23, %24, %30 : vector<1x32xi1>, vector<1x32xf32>
    %cst_11 = arith.constant 9.99999997E-7 : f32
    %32 = vector.broadcast %cst_11 : f32 to vector<1x32xf32>
    %33 = arith.addf %31, %32 : vector<1x32xf32>
    %c0_12 = arith.constant 0 : index
    %c0_13 = arith.constant 0 : index
    %34 = vector.load %arg4[%c0_12, %c0_13] : memref<1x32xf32, #tpu.memory_space<vmem>>, vector<1x32xf32>
    %c0_14 = arith.constant 0 : index
    %c0_15 = arith.constant 0 : index
    %35 = vector.load %arg6[%c0_14, %c0_15] : memref<1x32xf32, #tpu.memory_space<vmem>>, vector<1x32xf32>
    %36 = arith.mulf %35, %33 : vector<1x32xf32>
    %37 = arith.addf %34, %36 : vector<1x32xf32>
    %c0_16 = arith.constant 0 : index
    %c0_17 = arith.constant 0 : index
    %38 = vector.load %arg8[%c0_16, %c0_17] : memref<128x32xf32, #tpu.memory_space<vmem>>, vector<128x32xf32>
    %cst_18 = arith.constant 0.000000e+00 : f32
    %39 = vector.broadcast %cst_18 : f32 to vector<128x32xf32>
    %40 = arith.maximumf %38, %39 : vector<128x32xf32>
    %41 = arith.subf %38, %39 : vector<128x32xf32>
    %42 = arith.cmpf one, %41, %41 : vector<128x32xf32>
    %43 = arith.addf %38, %39 : vector<128x32xf32>
    %44 = math.absf %41 : vector<128x32xf32>
    %cst_19 = arith.constant 0.000000e+00 : f32
    %45 = vector.broadcast %cst_19 : f32 to vector<128x32xf32>
    %46 = arith.subf %45, %44 : vector<128x32xf32>
    %47 = math.exp %46 : vector<128x32xf32>
    %48 = math.log1p %47 : vector<128x32xf32>
    %49 = arith.addf %40, %48 : vector<128x32xf32>
    %50 = arith.select %42, %43, %49 : vector<128x32xi1>, vector<128x32xf32>
    %cst_20 = arith.constant 9.99999997E-7 : f32
    %51 = vector.broadcast %cst_20 : f32 to vector<128x32xf32>
    %52 = arith.addf %50, %51 : vector<128x32xf32>
    %c0_21 = arith.constant 0 : index
    %c0_22 = arith.constant 0 : index
    %53 = vector.load %arg7[%c0_21, %c0_22] : memref<128x32xf32, #tpu.memory_space<vmem>>, vector<128x32xf32>
    %c0_23 = arith.constant 0 : index
    %c0_24 = arith.constant 0 : index
    %54 = vector.load %arg9[%c0_23, %c0_24] : memref<128x32xf32, #tpu.memory_space<vmem>>, vector<128x32xf32>
    %55 = arith.mulf %54, %52 : vector<128x32xf32>
    %56 = arith.addf %53, %55 : vector<128x32xf32>
    %c0_25 = arith.constant 0 : index
    %c0_26 = arith.constant 0 : index
    %57 = vector.load %arg11[%c0_25, %c0_26] : memref<1x128xf32, #tpu.memory_space<vmem>>, vector<1x128xf32>
    %cst_27 = arith.constant 0.000000e+00 : f32
    %58 = vector.broadcast %cst_27 : f32 to vector<1x128xf32>
    %59 = arith.maximumf %57, %58 : vector<1x128xf32>
    %60 = arith.subf %57, %58 : vector<1x128xf32>
    %61 = arith.cmpf one, %60, %60 : vector<1x128xf32>
    %62 = arith.addf %57, %58 : vector<1x128xf32>
    %63 = math.absf %60 : vector<1x128xf32>
    %cst_28 = arith.constant 0.000000e+00 : f32
    %64 = vector.broadcast %cst_28 : f32 to vector<1x128xf32>
    %65 = arith.subf %64, %63 : vector<1x128xf32>
    %66 = math.exp %65 : vector<1x128xf32>
    %67 = math.log1p %66 : vector<1x128xf32>
    %68 = arith.addf %59, %67 : vector<1x128xf32>
    %69 = arith.select %61, %62, %68 : vector<1x128xi1>, vector<1x128xf32>
    %cst_29 = arith.constant 9.99999997E-7 : f32
    %70 = vector.broadcast %cst_29 : f32 to vector<1x128xf32>
    %71 = arith.addf %69, %70 : vector<1x128xf32>
    %c0_30 = arith.constant 0 : index
    %c0_31 = arith.constant 0 : index
    %72 = vector.load %arg10[%c0_30, %c0_31] : memref<1x128xf32, #tpu.memory_space<vmem>>, vector<1x128xf32>
    %c0_32 = arith.constant 0 : index
    %c0_33 = arith.constant 0 : index
    %73 = vector.load %arg12[%c0_32, %c0_33] : memref<1x128xf32, #tpu.memory_space<vmem>>, vector<1x128xf32>
    %74 = arith.mulf %73, %71 : vector<1x128xf32>
    %75 = arith.addf %72, %74 : vector<1x128xf32>
    %c0_34 = arith.constant 0 : index
    %c0_35 = arith.constant 0 : index
    %76 = vector.load %arg0[%c0_34, %c0_35] : memref<8x1024xf32, #tpu.memory_space<vmem>>, vector<8x1024xf32>
    %cst_36 = arith.constant dense<0.000000e+00> : vector<8x32xf32>
    %77 = tpu.matmul %76, %18, %cst_36 {dimension_numbers = #tpu.dot_dimension_numbers<[1], [1], [0], [0], [0, 0, 1, 0], [], []>} : vector<8x1024xf32>, vector<32x1024xf32>, vector<8x32xf32> -> vector<8x32xf32>
    %78 = vector.broadcast %37 : vector<1x32xf32> to vector<8x32xf32>
    %79 = arith.addf %77, %78 : vector<8x32xf32>
    %cst_37 = arith.constant 0.000000e+00 : f32
    %80 = vector.broadcast %cst_37 : f32 to vector<8x32xf32>
    %81 = arith.maximumf %79, %80 : vector<8x32xf32>
    %cst_38 = arith.constant dense<0.000000e+00> : vector<8x128xf32>
    %82 = tpu.matmul %81, %56, %cst_38 {dimension_numbers = #tpu.dot_dimension_numbers<[1], [1], [0], [0], [0, 0, 1, 0], [], []>} : vector<8x32xf32>, vector<128x32xf32>, vector<8x128xf32> -> vector<8x128xf32>
    %83 = vector.broadcast %75 : vector<1x128xf32> to vector<8x128xf32>
    %84 = arith.addf %82, %83 : vector<8x128xf32>
    %c0_39 = arith.constant 0 : index
    %c0_40 = arith.constant 0 : index
    %85 = vector.load %arg13[%c0_39, %c0_40] : memref<8x128xf32, #tpu.memory_space<vmem>>, vector<8x128xf32>
    tpu.vector_store %arg13[%c0_39, %c0_40], %84 {strides = array<i32>} : memref<8x128xf32, #tpu.memory_space<vmem>>, vector<8x128xf32>,
    return
  }
}

</mosaic_0001>

<bundles_post_ra>
// kernel: full_vi_forward.1
= control target key start
LH: loop header
LB: loop body
LE: loop exit
PB: predicated region body
PF: predicated region fallthrough
CT: control target
= control target key end

     0   :  { %s3036_s2 = inlined_call_operand.vmem [shape: f32[32,1024], index: 2, kind: input, shape index: {}]   ;;  %s3037_s3 = inlined_call_operand.vmem [shape: f32[32,1024], index: 3, kind: input, shape index: {}]   ;;  %s3038_s1 = inlined_call_operand.vmem [shape: f32[32,1024], index: 1, kind: input, shape index: {}]   ;;  %s3039_s0 = inlined_call_operand.vmem [shape: f32[8,1024], index: 0, kind: input, shape index: {}]   ;;  %s3040_s8 = inlined_call_operand.vmem [shape: f32[128,32], index: 8, kind: input, shape index: {}]   ;;  %s3041_s9 = inlined_call_operand.vmem [shape: f32[128,32], index: 9, kind: input, shape index: {}]   ;;  %s3042_s7 = inlined_call_operand.vmem [shape: f32[128,32], index: 7, kind: input, shape index: {}]   ;;  %s3043_s5 = inlined_call_operand.vmem [shape: f32[1,32], index: 5, kind: input, shape index: {}]   ;;  %s3044_s6 = inlined_call_operand.vmem [shape: f32[1,32], index: 6, kind: input, shape index: {}]   ;;  %s3045_s4 = inlined_call_operand.vmem [shape: f32[1,32], index: 4, kind: input, shape index: {}]   ;;  %s3046_s11 = inlined_call_operand.vmem [shape: f32[1,128], index: 11, kind: input, shape index: {}]   ;;  %s3047_s12 = inlined_call_operand.vmem [shape: f32[1,128], index: 12, kind: input, shape index: {}]   ;;  %s3048_s10 = inlined_call_operand.vmem [shape: f32[1,128], index: 10, kind: input, shape index: {}]   ;;  %s3049_s13 = inlined_call_operand.vmem [shape: f32[8,128], index: 13, kind: output, shape index: {}]  }
   0x1   :  { %v1786_v0 = vld [vmem:[%s3036_s2 + $0xc0] sm:$0xff]  ;;  %v1792_v2 = vld [vmem:[%s3036_s2 + $0xd0] sm:$0xff]  ;;  %v1835_v27 = vld [vmem:[%s3036_s2 + $0xd8] sm:$0xff] }
   0x2   :  { %v196_v1 = vand.u32 2147483647, %v1786_v0  ;;  %v198_v3 = vand.u32 2147483647, %v1792_v2  ;;  %v1798_v4 = vld [vmem:[%s3036_s2 + $0x80] sm:$0xff]  ;;  %v1803_v5 = vld [vmem:[%s3036_s2 + $0x90] sm:$0xff]  ;;  %vm132_vm1 = vcmp.ne.f32.partialorder %v1786_v0, %v1786_v0  ;;  %vm134_vm3 = vcmp.ne.f32.partialorder %v1792_v2, %v1792_v2 }
   0x3   :  { %v188_v7 = vand.u32 2147483647, %v1798_v4  ;;  %v1809_v8 = vld [vmem:[%s3036_s2 + $0x40] sm:$0xff]  ;;  %v190_v10 = vand.u32 2147483647, %v1803_v5  ;;  %v1815_v11 = vld [vmem:[%s3036_s2 + $0x50] sm:$0xff]  ;;  %vm124_vm4 = vcmp.ne.f32.partialorder %v1798_v4, %v1798_v4  ;;  %vm126_vm6 = vcmp.ne.f32.partialorder %v1803_v5, %v1803_v5 }
   0x4   :  { %v228_v6 = vsub.f32 0.0, %v196_v1  ;;  %v230_v9 = vsub.f32 0.0, %v198_v3  ;;  %v180_v16 = vand.u32 2147483647, %v1809_v8  ;;  %v1821_v17 = vld [vmem:[%s3036_s2] sm:$0xff]  ;;  %v100_v20 = vmax.f32 %v1786_v0, 0.0 }
   0x5   :  { %v220_v13 = vsub.f32 0.0, %v188_v7  ;;  %v222_v15 = vsub.f32 0.0, %v190_v10  ;;  %v182_v19 = vand.u32 2147483647, %v1815_v11  ;;  %v1828_v23 = vld [vmem:[%s3036_s2 + $0x10] sm:$0xff]  ;;  %v102_v24 = vmax.f32 %v1792_v2, 0.0 }
   0x6   :  { %v284_v12 = vmul.f32 1.442695, %v228_v6  ;;  %v288_v14 = vmul.f32 1.442695, %v230_v9  ;;  %v212_v22 = vsub.f32 0.0, %v180_v16  ;;  %v92_v28 = vmax.f32 %v1798_v4, 0.0 }
   0x7   :  { %v268_v18 = vmul.f32 1.442695, %v220_v13  ;;  %v272_v21 = vmul.f32 1.442695, %v222_v15  ;;  %v214_v25 = vsub.f32 0.0, %v182_v19  ;;  %v94_v29 = vmax.f32 %v1803_v5, 0.0 }
   0x8   :  { %1513 = vpow2.f32 %v284_v12  ;;  %v172_v26 = vand.u32 2147483647, %v1821_v17  ;;  %v252_v30 = vmul.f32 1.442695, %v212_v22  ;;  %v1842_v31 = vld [vmem:[%s3036_s2 + $0xc8] sm:$0xff]  ;;  %v84_v32 = vmax.f32 %v1809_v8, 0.0 }
   0x9   :  { %1515 = vpow2.f32 %v288_v14  ;;  %v256_v33 = vmul.f32 1.442695, %v214_v25  ;;  %v174_v35 = vand.u32 2147483647, %v1828_v23  ;;  %v86_v36 = vmax.f32 %v1815_v11, 0.0  ;;  %v740_v57 = vld [vmem:[%s3037_s3 + $0xc0] sm:$0xff] }
   0xa   :  { %1517 = vpow2.f32 %v268_v18  ;;  %v204_v34 = vsub.f32 0.0, %v172_v26  ;;  %v76_v37 = vmax.f32 %v1821_v17, 0.0  ;;  %v199_v38 = vand.u32 2147483647, %v1835_v27 }
   0xb   :  { %1519 = vpow2.f32 %v272_v21  ;;  %v1849_v41 = vsub.f32 0.0, %v174_v35  ;;  %v197_v42 = vand.u32 2147483647, %v1842_v31  ;;  %vm116_vm8 = vcmp.ne.f32.partialorder %v1809_v8, %v1809_v8 }
   0xc   :  { %1521 = vpow2.f32 %v252_v30  ;;  %v236_v40 = vmul.f32 1.442695, %v204_v34  ;;  %v1852_v47 = vsub.f32 0.0, %v199_v38  ;;  %vm118_vm10 = vcmp.ne.f32.partialorder %v1815_v11, %v1815_v11 }
   0xd   :  { %1523 = vpow2.f32 %v256_v33  ;;  %vm108_vm13 = vcmp.ne.f32.partialorder %v1821_v17, %v1821_v17  ;;  %vm110_vm14 = vcmp.ne.f32.partialorder %v1828_v23, %v1828_v23 }
   0xe   :  { %v1514_v39 = vpop.eup %1513  ;;  %1525 = vpow2.f32 %v236_v40 }
   0xf   :  { %v1516_v43 = vpop.eup %1515  ;;  %v516_v44 = vadd.f32 1.0, %v1514_v39  ;;  %v519_v45 = vmul.f32 -0.5, %v1514_v39  ;;  %v522_v46 = vand.u32 2147483647, %v1514_v39 }
  0x10   :  { %v1518_v48 = vpop.eup %1517  ;;  %v534_v49 = vadd.f32 1.0, %v1516_v43  ;;  %v537_v50 = vmul.f32 -0.5, %v1516_v43  ;;  %v540_v51 = vand.u32 2147483647, %v1516_v43 }
  0x11   :  { %v1520_v52 = vpop.eup %1519  ;;  %1527 = vlog2.f32 %v516_v44  ;;  %v520_v53 = vadd.f32 1.0, %v519_v45  ;;  %vm1854_vm0 = vcmp.lt.f32.partialorder %v522_v46, 0.0004427343  ;;  %v444_v55 = vadd.f32 1.0, %v1518_v48 }
  0x12   :  { %1529 = vlog2.f32 %v534_v49  ;;  %v538_v56 = vadd.f32 1.0, %v537_v50  ;;  %vm1860_vm2 = vcmp.lt.f32.partialorder %v540_v51, 0.0004427343  ;;  %v447_v58 = vmul.f32 -0.5, %v1518_v48  ;;  %v1522_v59 = vpop.eup %1521 }
  0x13   :  { %v521_v60 = vmul.f32 %v1514_v39, %v520_v53  ;;  %1531 = vlog2.f32 %v444_v55  ;;  %v450_v61 = vand.u32 2147483647, %v1518_v48  ;;  %v462_v62 = vadd.f32 1.0, %v1520_v52  ;;  %v1524_v63 = vpop.eup %1523 }
  0x14   :  { %v539_v1 = vmul.f32 %v1516_v43, %v538_v56  ;;  %v448_v3 = vadd.f32 1.0, %v447_v58  ;;  %v465_v6 = vmul.f32 -0.5, %v1520_v52  ;;  %v468_v7 = vand.u32 2147483647, %v1520_v52  ;;  %v1872_v13 = vpop.eup %1525 }
  0x15   :  { %vm1868_vm5 = vcmp.lt.f32.partialorder %v450_v61, 0.0004427343  ;;  %1533 = vlog2.f32 %v462_v62  ;;  %v372_v10 = vadd.f32 1.0, %v1522_v59  ;;  %v375_v12 = vmul.f32 -0.5, %v1522_v59 }
  0x16   :  { %v449_v14 = vmul.f32 %v1518_v48, %v448_v3  ;;  %v466_v15 = vadd.f32 1.0, %v465_v6  ;;  %vm1876_vm7 = vcmp.lt.f32.partialorder %v468_v7, 0.0004427343  ;;  %v378_v18 = vand.u32 2147483647, %v1522_v59 }
  0x17   :  { %v1528_v19 = vpop.eup %1527  ;;  %1535 = vlog2.f32 %v372_v10  ;;  %v376_v21 = vadd.f32 1.0, %v375_v12  ;;  %v390_v22 = vadd.f32 1.0, %v1524_v63  ;;  %v393_v25 = vmul.f32 -0.5, %v1524_v63 }
  0x18   :  { %v1530_v26 = vpop.eup %1529  ;;  %v518_v30 = vmul.f32 0.6931472, %v1528_v19  ;;  %v467_v33 = vmul.f32 %v1520_v52, %v466_v15  ;;  %vm1882_vm9 = vcmp.lt.f32.partialorder %v378_v18, 0.0004427343  ;;  %v396_v35 = vand.u32 2147483647, %v1524_v63 }
  0x19   :  { %v1532_v38 = vpop.eup %1531  ;;  %v536_v39 = vmul.f32 0.6931472, %v1530_v26  ;;  %v377_v40 = vmul.f32 %v1522_v59, %v376_v21  ;;  %1537 = vlog2.f32 %v390_v22  ;;  %v394_v43 = vadd.f32 1.0, %v393_v25  ;;  %v700_v19 = vld [vmem:[%s3038_s1 + $0x80] sm:$0xff] }
  0x1a   :  { %v524_v44 = vsel %vm1854_vm0, %v521_v60, %v518_v30  ;;  %v446_v45 = vmul.f32 0.6931472, %v1532_v38  ;;  %vm1890_vm11 = vcmp.lt.f32.partialorder %v396_v35, 0.0004427343  ;;  %v300_v48 = vadd.f32 1.0, %v1872_v13 }
  0x1b   :  { %v1534_v49 = vpop.eup %1533  ;;  %v612_v50 = vadd.f32 %v524_v44, %v100_v20  ;;  %v542_v51 = vsel %vm1860_vm2, %v539_v1, %v536_v39  ;;  %v395_v52 = vmul.f32 %v1524_v63, %v394_v43  ;;  %v303_v53 = vmul.f32 -0.5, %v1872_v13  ;;  %v724_v39 = vld [vmem:[%s3037_s3 + $0x40] sm:$0xff] }
  0x1c   :  { %v614_v54 = vadd.f32 %v542_v51, %v102_v24  ;;  %v452_v55 = vsel %vm1868_vm5, %v449_v14, %v446_v45  ;;  %v464_v56 = vmul.f32 0.6931472, %v1534_v49  ;;  %1539 = vlog2.f32 %v300_v48  ;;  %v710_v14 = vld [vmem:[%s3038_s1 + $0xd0] sm:$0xff]  ;;  %v692_v49 = vld [vmem:[%s3038_s1 + $0x40] sm:$0xff] }
  0x1d   :  { %v1536_v58 = vpop.eup %1535  ;;  %v644_v20 = vsel %vm132_vm1, %v1786_v0, %v612_v50  ;;  %v604_v59 = vadd.f32 %v452_v55, %v92_v28  ;;  %v304_v60 = vadd.f32 1.0, %v303_v53  ;;  %v306_v24 = vand.u32 2147483647, %v1872_v13  ;;  %v742_v0 = vld [vmem:[%s3037_s3 + $0xd0] sm:$0xff]  ;;  %v708_v28 = vld [vmem:[%s3038_s1 + $0xc0] sm:$0xff] }
  0x1e   :  { %v676_v61 = vadd.f32 1e-06, %v644_v20  ;;  %v646_v62 = vsel %vm134_vm3, %v1792_v2, %v614_v54  ;;  %v470_v63 = vsel %vm1876_vm7, %v467_v33, %v464_v56  ;;  %v374_v1 = vmul.f32 0.6931472, %v1536_v58  ;;  %v732_v2 = vld [vmem:[%s3037_s3 + $0x80] sm:$0xff] }
  0x1f   :  { %v1538_v3 = vpop.eup %1537  ;;  %v678_v6 = vadd.f32 1e-06, %v646_v62  ;;  %v636_v7 = vsel %vm124_vm4, %v1798_v4, %v604_v59  ;;  %v606_v9 = vadd.f32 %v470_v63, %v94_v29  ;;  %v305_v10 = vmul.f32 %v1872_v13, %v304_v60  ;;  %v734_v13 = vld [vmem:[%s3037_s3 + $0x90] sm:$0xff] }
  0x20   :  { %v772_v12 = vmul.f32 %v740_v57, %v676_v61  ;;  %v668_v15 = vadd.f32 1e-06, %v636_v7  ;;  %v380_v16 = vsel %vm1882_vm9, %v377_v40, %v374_v1  ;;  %v392_v18 = vmul.f32 0.6931472, %v1538_v3  ;;  %v716_v57 = vld [vmem:[%s3037_s3] sm:$0xff] }
  0x21   :  { %v774_v4 = vmul.f32 %v742_v0, %v678_v6  ;;  %v638_v29 = vsel %vm126_vm6, %v1803_v5, %v606_v9  ;;  %v596_v21 = vadd.f32 %v380_v16, %v84_v32  ;;  %vm1953_vm12 = vcmp.lt.f32.partialorder %v306_v24, 0.0004427343  ;;  %v1962_v5 = vld [vmem:[%s3036_s2 + $0xe0] sm:$0xff]  ;;  %v702_v32 = vld [vmem:[%s3038_s1 + $0x90] sm:$0xff] }
  0x22   :  { %v1540_v25 = vpop.eup %1539  ;;  %v804_v26 = vadd.f32 %v772_v12, %v708_v28  ;;  %v764_v30 = vmul.f32 %v732_v2, %v668_v15  ;;  %v670_v33 = vadd.f32 1e-06, %v638_v29  ;;  %v398_v34 = vsel %vm1890_vm11, %v395_v52, %v392_v18  ;;  %v684_v24 = vld [vmem:[%s3038_s1] sm:$0xff] }
  0x23   :  { %v806_v35 = vadd.f32 %v774_v4, %v710_v14  ;;  %v628_v38 = vsel %vm116_vm8, %v1809_v8, %v596_v21  ;;  %v598_v40 = vadd.f32 %v398_v34, %v86_v36  ;;  %v302_v43 = vmul.f32 0.6931472, %v1540_v25  ;;  %v726_v36 = vld [vmem:[%s3037_s3 + $0x50] sm:$0xff]  ;;  %v2023_v28 = vld [vmem:[%s3036_s2 + $0xa0] sm:$0xff] }
  0x24   :  { %1267 = vmatpush.xpose.msra.mxu1 %v804_v26  ;;  %v796_v44 = vadd.f32 %v764_v30, %v700_v19  ;;  %v766_v45 = vmul.f32 %v734_v13, %v670_v33  ;;  %v660_v46 = vadd.f32 1e-06, %v628_v38  ;;  %v240_v48 = vmul.f32 1.442695, %v1849_v41  ;;  %v2035_v33 = vld [vmem:[%s3036_s2 + $0x58] sm:$0xff] }
  0x25   :  { %1307 = vmatpush.xpose.msra.mxu2 %v806_v35  ;;  %v630_v8 = vsel %vm118_vm10, %v1815_v11, %v598_v40  ;;  %v308_v41 = vsel %vm1953_vm12, %v305_v10, %v302_v43  ;;  %v200_v50 = vand.u32 2147483647, %v1962_v5  ;;  %v694_v11 = vld [vmem:[%s3038_s1 + $0x50] sm:$0xff]  ;;  %v290_v55 = vmul.f32 1.442695, %v1852_v47  ;;  %v2012_v47 = vld [vmem:[%s3036_s2 + $0x88] sm:$0xff] }
  0x26   :  { %v798_v51 = vadd.f32 %v766_v45, %v702_v32  ;;  %v756_v52 = vmul.f32 %v724_v39, %v660_v46  ;;  %v662_v53 = vadd.f32 1e-06, %v630_v8  ;;  %v588_v54 = vadd.f32 %v308_v41, %v76_v37  ;;  %v2007_v37 = vld [vmem:[%s3036_s2 + $0x98] sm:$0xff] }
  0x27   :  { %1541 = vpow2.f32 %v240_v48  ;;  %v229_v59 = vsub.f32 0.0, %v197_v42  ;;  %v232_v42 = vsub.f32 0.0, %v200_v50  ;;  %v191_v0 = vand.u32 2147483647, %v2007_v37 }
  0x28   :  { %1268 = vmatpush.xpose.msra.mxu1 %v796_v44  ;;  %v788_v56 = vadd.f32 %v756_v52, %v692_v49  ;;  %v758_v58 = vmul.f32 %v726_v36, %v662_v53  ;;  %v620_v20 = vsel %vm108_vm13, %v1821_v17, %v588_v54  ;;  %1543 = vpow2.f32 %v290_v55 }
  0x29   :  { %1308 = vmatpush.xpose.msra.mxu2 %v798_v51  ;;  %v652_v60 = vadd.f32 1e-06, %v620_v20  ;;  %v286_v61 = vmul.f32 1.442695, %v229_v59  ;;  %v78_v63 = vmax.f32 %v1828_v23, 0.0  ;;  %v103_v2 = vmax.f32 %v1835_v27, 0.0 }
  0x2a   :  { %v790_v17 = vadd.f32 %v758_v58, %v694_v11  ;;  %v292_v1 = vmul.f32 1.442695, %v232_v42  ;;  %v189_v3 = vand.u32 2147483647, %v2012_v47  ;;  %v101_v9 = vmax.f32 %v1842_v31, 0.0 }
  0x2b   :  { %v748_v62 = vmul.f32 %v716_v57, %v652_v60  ;;  %1545 = vpow2.f32 %v286_v61  ;;  %v223_v10 = vsub.f32 0.0, %v191_v0  ;;  %v104_v18 = vmax.f32 %v1962_v5, 0.0 }
  0x2c   :  { %1269 = vmatpush.xpose.msra.mxu1 %v788_v56  ;;  %1547 = vpow2.f32 %v292_v1  ;;  %v221_v19 = vsub.f32 0.0, %v189_v3  ;;  %v192_v29 = vand.u32 2147483647, %v2023_v28  ;;  %v95_v22 = vmax.f32 %v2007_v37, 0.0 }
  0x2d   :  { %v1542_v6 = vpop.eup %1541  ;;  %1309 = vmatpush.xpose.msra.mxu2 %v790_v17  ;;  %v780_v7 = vadd.f32 %v748_v62, %v684_v24  ;;  %v274_v4 = vmul.f32 1.442695, %v223_v10  ;;  %v93_v32 = vmax.f32 %v2012_v47, 0.0  ;;  %vm135_vm0 = vcmp.ne.f32.partialorder %v1835_v27, %v1835_v27 }
  0x2e   :  { %v318_v12 = vadd.f32 1.0, %v1542_v6  ;;  %v321_v14 = vmul.f32 -0.5, %v1542_v6  ;;  %v324_v15 = vand.u32 2147483647, %v1542_v6  ;;  %v1544_v16 = vpop.eup %1543  ;;  %v270_v30 = vmul.f32 1.442695, %v221_v19 }
  0x2f   :  { %v543_v21 = vadd.f32 1.0, %v1544_v16  ;;  %v546_v25 = vmul.f32 -0.5, %v1544_v16  ;;  %v549_v26 = vand.u32 2147483647, %v1544_v16  ;;  %v224_v38 = vsub.f32 0.0, %v192_v29  ;;  %v2166_v29 = vld [vmem:[%s3036_s2 + $0x60] sm:$0xff] }
  0x30   :  { %1270 = vmatpush.xpose.msra.mxu1 %v780_v7  ;;  %1549 = vlog2.f32 %v318_v12  ;;  %v322_v13 = vadd.f32 1.0, %v321_v14  ;;  %vm2037_vm15 = vcmp.lt.f32.partialorder %v324_v15, 0.0004427343  ;;  %v183_v49 = vand.u32 2147483647, %v2035_v33 }
  0x31   :  { %1551 = vpow2.f32 %v274_v4  ;;  %v1546_v34 = vpop.eup %1545  ;;  %v547_v40 = vadd.f32 1.0, %v546_v25  ;;  %v276_v48 = vmul.f32 1.442695, %v224_v38  ;;  %vm2045_vm1 = vcmp.lt.f32.partialorder %v549_v26, 0.0004427343  ;;  %v686_v26 = vld [vmem:[%s3038_s1 + $0x10] sm:$0xff] }
  0x32   :  { %1553 = vlog2.f32 %v543_v21  ;;  %v323_v39 = vmul.f32 %v1542_v6, %v322_v13  ;;  %v525_v43 = vadd.f32 1.0, %v1546_v34  ;;  %v528_v44 = vmul.f32 -0.5, %v1546_v34  ;;  %v1548_v45 = vpop.eup %1547 }
  0x33   :  { %v531_v46 = vand.u32 2147483647, %v1546_v34  ;;  %1555 = vpow2.f32 %v270_v30  ;;  %v552_v41 = vadd.f32 1.0, %v1548_v45  ;;  %v548_v51 = vmul.f32 %v1544_v16, %v547_v40  ;;  %v743_v30 = vld [vmem:[%s3037_s3 + $0xd8] sm:$0xff] }
  0x34   :  { %1557 = vlog2.f32 %v525_v43  ;;  %v529_v36 = vadd.f32 1.0, %v528_v44  ;;  %vm133_vm2 = vcmp.ne.f32.partialorder %v1842_v31, %v1842_v31  ;;  %v555_v52 = vmul.f32 -0.5, %v1548_v45 }
  0x35   :  { %v558_v53 = vand.u32 2147483647, %v1548_v45  ;;  %1559 = vpow2.f32 %v276_v48  ;;  %vm2051_vm3 = vcmp.lt.f32.partialorder %v531_v46, 0.0004427343  ;;  %v215_v56 = vsub.f32 0.0, %v183_v49  ;;  %v711_v46 = vld [vmem:[%s3038_s1 + $0xd8] sm:$0xff] }
  0x36   :  { %v1550_v50 = vpop.eup %1549  ;;  %1561 = vlog2.f32 %v552_v41  ;;  %v530_v20 = vmul.f32 %v1546_v34, %v529_v36  ;;  %vm136_vm4 = vcmp.ne.f32.partialorder %v1962_v5, %v1962_v5  ;;  %v556_v57 = vadd.f32 1.0, %v555_v52 }
  0x37   :  { %v1552_v54 = vpop.eup %1551  ;;  %v320_v11 = vmul.f32 0.6931472, %v1550_v50  ;;  %vm2059_vm5 = vcmp.lt.f32.partialorder %v558_v53, 0.0004427343  ;;  %v258_v3 = vmul.f32 1.442695, %v215_v56  ;;  %vm127_vm6 = vcmp.ne.f32.partialorder %v2007_v37, %v2007_v37 }
  0x38   :  { %v1554_v58 = vpop.eup %1553  ;;  %v471_v59 = vadd.f32 1.0, %v1552_v54  ;;  %v474_v60 = vmul.f32 -0.5, %v1552_v54  ;;  %v477_v42 = vand.u32 2147483647, %v1552_v54  ;;  %v557_v10 = vmul.f32 %v1548_v45, %v556_v57  ;;  %v741_v50 = vld [vmem:[%s3037_s3 + $0xc8] sm:$0xff] }
  0x39   :  { %v326_v17 = vsel %vm2037_vm15, %v323_v39, %v320_v11  ;;  %v545_v24 = vmul.f32 0.6931472, %v1554_v58  ;;  %v1556_v62 = vpop.eup %1555  ;;  %vm125_vm8 = vcmp.ne.f32.partialorder %v2012_v47, %v2012_v47  ;;  %v1244_v39 = vld [vmem:[%s3039_s0] sm:$0xff]  ;;  %v2118_v11 = vld [vmem:[%s3036_s2 + $0x48] sm:$0xff]  ;;  %vm128_vm11 = vcmp.ne.f32.partialorder %v2023_v28, %v2023_v28 }
  0x3a   :  { %v590_v0 = vadd.f32 %v326_v17, %v78_v63  ;;  %1563 = vlog2.f32 %v471_v59  ;;  %v475_v1 = vadd.f32 1.0, %v474_v60  ;;  %v1558_v6 = vpop.eup %1557  ;;  %v453_v12 = vadd.f32 1.0, %v1556_v62  ;;  %v718_v63 = vld [vmem:[%s3037_s3 + $0x10] sm:$0xff]  ;;  %1271 = vmatmul.f32.vlgmr.msra.gmra.mxu1 %v1244_v39  ;;  %v744_v58 = vld [vmem:[%s3037_s3 + $0xe0] sm:$0xff]  ;;  %v2187_v39 = vld [vmem:[%s3036_s2 + $0x18] sm:$0xff] }
  0x3b   :  { %v551_v7 = vsel %vm2045_vm1, %v548_v51, %v545_v24  ;;  %v456_v14 = vmul.f32 -0.5, %v1556_v62  ;;  %v1560_v15 = vpop.eup %1559  ;;  %v527_v19 = vmul.f32 0.6931472, %v1558_v6  ;;  %vm2078_vm7 = vcmp.lt.f32.partialorder %v477_v42, 0.0004427343 }
  0x3c   :  { %v622_v16 = vsel %vm110_vm14, %v1828_v23, %v590_v0  ;;  %v615_v4 = vadd.f32 %v551_v7, %v103_v2  ;;  %v1562_v13 = vpop.eup %1561  ;;  %v476_v25 = vmul.f32 %v1552_v54, %v475_v1  ;;  %1565 = vlog2.f32 %v453_v12  ;;  %v735_v12 = vld [vmem:[%s3037_s3 + $0x98] sm:$0xff] }
  0x3d   :  { %v654_v21 = vadd.f32 1e-06, %v622_v16  ;;  %v457_v23 = vadd.f32 1.0, %v456_v14  ;;  %v533_v34 = vsel %vm2051_vm3, %v530_v20, %v527_v19  ;;  %v554_v35 = vmul.f32 0.6931472, %v1562_v13 }
  0x3e   :  { %v647_v2 = vsel %vm135_vm0, %v1835_v27, %v615_v4  ;;  %v480_v38 = vadd.f32 1.0, %v1560_v15  ;;  %v613_v27 = vadd.f32 %v533_v34, %v101_v9  ;;  %v459_v44 = vand.u32 2147483647, %v1556_v62 }
  0x3f   :  { %v750_v40 = vmul.f32 %v718_v63, %v654_v21  ;;  %v679_v43 = vadd.f32 1e-06, %v647_v2  ;;  %v560_v48 = vsel %vm2059_vm5, %v557_v10, %v554_v35  ;;  %v458_v49 = vmul.f32 %v1556_v62, %v457_v23  ;;  %v733_v21 = vld [vmem:[%s3037_s3 + $0x88] sm:$0xff] }
  0x40   :  { %v1564_v45 = vpop.eup %1563  ;;  %1567 = vlog2.f32 %v480_v38  ;;  %v483_v8 = vmul.f32 -0.5, %v1560_v15  ;;  %v645_v9 = vsel %vm133_vm2, %v1842_v31, %v613_v27  ;;  %v616_v51 = vadd.f32 %v560_v48, %v104_v18  ;;  %v709_v31 = vld [vmem:[%s3038_s1 + $0xc8] sm:$0xff] }
  0x41   :  { %v782_v36 = vadd.f32 %v750_v40, %v686_v26  ;;  %v775_v41 = vmul.f32 %v743_v30, %v679_v43  ;;  %v677_v52 = vadd.f32 1e-06, %v645_v9  ;;  %v473_v53 = vmul.f32 0.6931472, %v1564_v45  ;;  %v701_v35 = vld [vmem:[%s3038_s1 + $0x88] sm:$0xff]  ;;  %v2208_v9 = vld [vmem:[%s3036_s2 + $0x20] sm:$0xff] }
  0x42   :  { %v484_v54 = vadd.f32 1.0, %v483_v8  ;;  %1569 = vpow2.f32 %v258_v3  ;;  %v1566_v55 = vpop.eup %1565  ;;  %v648_v18 = vsel %vm136_vm4, %v1962_v5, %v616_v51  ;;  %vm2130_vm9 = vcmp.lt.f32.partialorder %v459_v44, 0.0004427343  ;;  %v712_v5 = vld [vmem:[%s3038_s1 + $0xe0] sm:$0xff]  ;;  %v2199_v8 = vld [vmem:[%s3036_s2 + $0x8] sm:$0xff] }
  0x43   :  { %1310 = vmatpush.xpose.msra.mxu2 %v782_v36  ;;  %v807_v56 = vadd.f32 %v775_v41, %v711_v46  ;;  %v486_v57 = vand.u32 2147483647, %v1560_v15  ;;  %v773_v59 = vmul.f32 %v741_v50, %v677_v52  ;;  %v680_v60 = vadd.f32 1e-06, %v648_v18  ;;  %v736_v44 = vld [vmem:[%s3037_s3 + $0xa0] sm:$0xff] }
  0x44   :  { %v479_v17 = vsel %vm2078_vm7, %v476_v25, %v473_v53  ;;  %v455_v24 = vmul.f32 0.6931472, %v1566_v55  ;;  %v96_v42 = vmax.f32 %v2023_v28, 0.0  ;;  %v485_v62 = vmul.f32 %v1560_v15, %v484_v54 }
  0x45   :  { %1327 = vmatpush.xpose.msra.mxu3 %v807_v56  ;;  %v607_v61 = vadd.f32 %v479_v17, %v95_v22  ;;  %vm2142_vm10 = vcmp.lt.f32.partialorder %v486_v57, 0.0004427343  ;;  %v805_v3 = vadd.f32 %v773_v59, %v709_v31  ;;  %v776_v6 = vmul.f32 %v744_v58, %v680_v60  ;;  %v2217_v56 = vld [vmem:[%s3036_s2 + $0xe8] sm:$0xff] }
  0x46   :  { %v1568_v1 = vpop.eup %1567  ;;  %v461_v7 = vsel %vm2130_vm9, %v458_v49, %v455_v24  ;;  %v181_v10 = vand.u32 2147483647, %v2118_v11  ;;  %v184_v38 = vand.u32 2147483647, %v2166_v29  ;;  %v175_v41 = vand.u32 2147483647, %v2187_v39 }
  0x47   :  { %v639_v22 = vsel %vm127_vm6, %v2007_v37, %v607_v61  ;;  %v605_v14 = vadd.f32 %v461_v7, %v93_v32  ;;  %v482_v15 = vmul.f32 0.6931472, %v1568_v1  ;;  %1287 = vmatpush.xpose.msrb.mxu1 %v805_v3  ;;  %v808_v63 = vadd.f32 %v776_v6, %v712_v5  ;;  %v1246_v37 = vld [vmem:[%s3039_s0 + $0x10] sm:$0xff]  ;;  %v703_v32 = vld [vmem:[%s3038_s1 + $0x98] sm:$0xff] }
  0x48   :  { %v1570_v16 = vpop.eup %1569  ;;  %v671_v4 = vadd.f32 1e-06, %v639_v22  ;;  %v213_v19 = vsub.f32 0.0, %v181_v10  ;;  %1311 = vmatmul.f32.vlgmr.msra.gmra.mxu2 %v1246_v37  ;;  %v216_v49 = vsub.f32 0.0, %v184_v38  ;;  %v87_v51 = vmax.f32 %v2035_v33, 0.0  ;;  %v2234_v7 = vld [vmem:[%s3036_s2 + $0xf0] sm:$0xff] }
  0x49   :  { %v637_v13 = vsel %vm125_vm8, %v2012_v47, %v605_v14  ;;  %v488_v25 = vsel %vm2142_vm10, %v485_v62, %v482_v15  ;;  %v399_v23 = vadd.f32 1.0, %v1570_v16  ;;  %v402_v26 = vmul.f32 -0.5, %v1570_v16  ;;  %1347 = vmatpush.xpose.msrb.mxu2 %v808_v63  ;;  %v2258_v38 = vld [vmem:[%s3036_s2 + $0xf8] sm:$0xff] }
  0x4a   :  { %v767_v2 = vmul.f32 %v735_v12, %v671_v4  ;;  %v669_v30 = vadd.f32 1e-06, %v637_v13  ;;  %v608_v34 = vadd.f32 %v488_v25, %v96_v42  ;;  %v254_v47 = vmul.f32 1.442695, %v213_v19  ;;  %v727_v19 = vld [vmem:[%s3037_s3 + $0x58] sm:$0xff] }
  0x4b   :  { %1571 = vlog2.f32 %v399_v23  ;;  %v403_v45 = vadd.f32 1.0, %v402_v26  ;;  %v405_v48 = vand.u32 2147483647, %v1570_v16  ;;  %v260_v52 = vmul.f32 1.442695, %v216_v49 }
  0x4c   :  { %v799_v40 = vadd.f32 %v767_v2, %v703_v32  ;;  %v765_v43 = vmul.f32 %v733_v21, %v669_v30  ;;  %v640_v27 = vsel %vm128_vm11, %v2023_v28, %v608_v34  ;;  %1573 = vpow2.f32 %v254_v47  ;;  %v704_v28 = vld [vmem:[%s3038_s1 + $0xa0] sm:$0xff] }
  0x4d   :  { %v672_v46 = vadd.f32 1e-06, %v640_v27  ;;  %vm119_vm12 = vcmp.ne.f32.partialorder %v2035_v33, %v2035_v33  ;;  %v404_v53 = vmul.f32 %v1570_v16, %v403_v45  ;;  %v207_v54 = vsub.f32 0.0, %v175_v41 }
  0x4e   :  { %1328 = vmatpush.xpose.msra.mxu3 %v799_v40  ;;  %v797_v36 = vadd.f32 %v765_v43, %v701_v35  ;;  %v173_v55 = vand.u32 2147483647, %v2199_v8  ;;  %vm2219_vm13 = vcmp.lt.f32.partialorder %v405_v48, 0.0004427343  ;;  %1575 = vpow2.f32 %v260_v52 }
  0x4f   :  { %v768_v50 = vmul.f32 %v736_v44, %v672_v46  ;;  %v176_v20 = vand.u32 2147483647, %v2208_v9  ;;  %v85_v59 = vmax.f32 %v2118_v11, 0.0  ;;  %v242_v60 = vmul.f32 1.442695, %v207_v54 }
  0x50   :  { %1288 = vmatpush.xpose.msrb.mxu1 %v797_v36  ;;  %v205_v17 = vsub.f32 0.0, %v173_v55  ;;  %v88_v5 = vmax.f32 %v2166_v29, 0.0  ;;  %v79_v61 = vmax.f32 %v2187_v39, 0.0  ;;  %v201_v62 = vand.u32 2147483647, %v2217_v56 }
  0x51   :  { %v1572_v31 = vpop.eup %1571  ;;  %v800_v18 = vadd.f32 %v768_v50, %v704_v28  ;;  %v208_v42 = vsub.f32 0.0, %v176_v20  ;;  %v77_v6 = vmax.f32 %v2199_v8, 0.0  ;;  %1577 = vpow2.f32 %v242_v60 }
  0x52   :  { %v401_v57 = vmul.f32 0.6931472, %v1572_v31  ;;  %v1574_v24 = vpop.eup %1573  ;;  %v238_v22 = vmul.f32 1.442695, %v205_v17  ;;  %v80_v15 = vmax.f32 %v2208_v9, 0.0  ;;  %v233_v16 = vsub.f32 0.0, %v201_v62 }
  0x53   :  { %1348 = vmatpush.xpose.msrb.mxu2 %v800_v18  ;;  %v381_v1 = vadd.f32 1.0, %v1574_v24  ;;  %v384_v3 = vmul.f32 -0.5, %v1574_v24  ;;  %v244_v12 = vmul.f32 1.442695, %v208_v42  ;;  %v387_v14 = vand.u32 2147483647, %v1574_v24 }
  0x54   :  { %v407_v0 = vsel %vm2219_vm13, %v404_v53, %v401_v57  ;;  %v1576_v63 = vpop.eup %1575  ;;  %vm117_vm14 = vcmp.ne.f32.partialorder %v2118_v11, %v2118_v11  ;;  %v202_v32 = vand.u32 2147483647, %v2234_v7  ;;  %v105_v23 = vmax.f32 %v2217_v56, 0.0 }
  0x55   :  { %v599_v10 = vadd.f32 %v407_v0, %v87_v51  ;;  %1579 = vlog2.f32 %v381_v1  ;;  %v385_v37 = vadd.f32 1.0, %v384_v3  ;;  %v408_v21 = vadd.f32 1.0, %v1576_v63 }
  0x56   :  { %1581 = vpow2.f32 %v238_v22  ;;  %v411_v25 = vmul.f32 -0.5, %v1576_v63  ;;  %v414_v26 = vand.u32 2147483647, %v1576_v63  ;;  %v294_v2 = vmul.f32 1.442695, %v233_v16 }
  0x57   :  { %v631_v4 = vsel %vm119_vm12, %v2035_v33, %v599_v10  ;;  %v695_v33 = vld [vmem:[%s3038_s1 + $0x58] sm:$0xff]  ;;  %1583 = vpow2.f32 %v244_v12  ;;  %v234_v30 = vsub.f32 0.0, %v202_v32  ;;  %vm2251_vm15 = vcmp.lt.f32.partialorder %v387_v14, 0.0004427343  ;;  %v1578_v40 = vpop.eup %1577 }
  0x58   :  { %v663_v13 = vadd.f32 1e-06, %v631_v4  ;;  %1585 = vlog2.f32 %v408_v21  ;;  %v412_v47 = vadd.f32 1.0, %v411_v25  ;;  %v386_v43 = vmul.f32 %v1574_v24, %v385_v37 }
  0x59   :  { %vm120_vm0 = vcmp.ne.f32.partialorder %v2166_v29, %v2166_v29  ;;  %vm2262_vm1 = vcmp.lt.f32.partialorder %v414_v26, 0.0004427343  ;;  %1587 = vpow2.f32 %v294_v2  ;;  %v296_v44 = vmul.f32 1.442695, %v234_v30 }
  0x5a   :  { %v759_v34 = vmul.f32 %v727_v19, %v663_v13  ;;  %v413_v48 = vmul.f32 %v1576_v63, %v412_v47  ;;  %v327_v49 = vadd.f32 1.0, %v1578_v40  ;;  %v330_v36 = vmul.f32 -0.5, %v1578_v40  ;;  %v688_v13 = vld [vmem:[%s3038_s1 + $0x20] sm:$0xff] }
  0x5b   :  { %v1580_v45 = vpop.eup %1579  ;;  %v333_v50 = vand.u32 2147483647, %v1578_v40  ;;  %1589 = vpow2.f32 %v296_v44  ;;  %v203_v51 = vand.u32 2147483647, %v2258_v38  ;;  %vm111_vm2 = vcmp.ne.f32.partialorder %v2187_v39, %v2187_v39 }
  0x5c   :  { %v791_v46 = vadd.f32 %v759_v34, %v695_v33  ;;  %v1582_v28 = vpop.eup %1581  ;;  %v383_v41 = vmul.f32 0.6931472, %v1580_v45  ;;  %1591 = vlog2.f32 %v327_v49  ;;  %v331_v52 = vadd.f32 1.0, %v330_v36 }
  0x5d   :  { %v309_v53 = vadd.f32 1.0, %v1582_v28  ;;  %v312_v54 = vmul.f32 -0.5, %v1582_v28  ;;  %v1584_v55 = vpop.eup %1583  ;;  %vm2271_vm3 = vcmp.lt.f32.partialorder %v333_v50, 0.0004427343  ;;  %v315_v58 = vand.u32 2147483647, %v1582_v28 }
  0x5e   :  { %1329 = vmatpush.xpose.msra.mxu3 %v791_v46  ;;  %v389_v31 = vsel %vm2251_vm15, %v386_v43, %v383_v41  ;;  %v235_v20 = vsub.f32 0.0, %v203_v51  ;;  %v1586_v57 = vpop.eup %1585  ;;  %v332_v17 = vmul.f32 %v1578_v40, %v331_v52  ;;  %vm109_vm4 = vcmp.ne.f32.partialorder %v2199_v8, %v2199_v8  ;;  %v696_v46 = vld [vmem:[%s3038_s1 + $0x60] sm:$0xff] }
  0x5f   :  { %v597_v60 = vadd.f32 %v389_v31, %v85_v59  ;;  %1593 = vlog2.f32 %v309_v53  ;;  %v313_v24 = vadd.f32 1.0, %v312_v54  ;;  %v1588_v42 = vpop.eup %1587  ;;  %v410_v62 = vmul.f32 0.6931472, %v1586_v57  ;;  %v725_v59 = vld [vmem:[%s3037_s3 + $0x48] sm:$0xff]  ;;  %v719_v53 = vld [vmem:[%s3037_s3 + $0x18] sm:$0xff] }
  0x60   :  { %vm2279_vm5 = vcmp.lt.f32.partialorder %v315_v58, 0.0004427343  ;;  %v336_v1 = vadd.f32 1.0, %v1584_v55  ;;  %v339_v3 = vmul.f32 -0.5, %v1584_v55  ;;  %v342_v12 = vand.u32 2147483647, %v1584_v55 }
  0x61   :  { %v629_v10 = vsel %vm117_vm14, %v2118_v11, %v597_v60  ;;  %v314_v22 = vmul.f32 %v1582_v28, %v313_v24  ;;  %v561_v14 = vadd.f32 1.0, %v1588_v42  ;;  %v2290_v16 = vpop.eup %1589  ;;  %v416_v4 = vsel %vm2262_vm1, %v413_v48, %v410_v62  ;;  %v693_v11 = vld [vmem:[%s3038_s1 + $0x48] sm:$0xff] }
  0x62   :  { %v661_v63 = vadd.f32 1e-06, %v629_v10  ;;  %1595 = vlog2.f32 %v336_v1  ;;  %v340_v19 = vadd.f32 1.0, %v339_v3  ;;  %v1592_v37 = vpop.eup %1591  ;;  %v600_v32 = vadd.f32 %v416_v4, %v88_v5  ;;  %v728_v5 = vld [vmem:[%s3037_s3 + $0x60] sm:$0xff]  ;;  %v2342_v60 = vld [vmem:[%s3036_s2 + $0xa8] sm:$0xff]  ;;  %v2382_v4 = vld [vmem:[%s3036_s2 + $0xb0] sm:$0xff] }
  0x63   :  { %vm112_vm6 = vcmp.ne.f32.partialorder %v2208_v9, %v2208_v9  ;;  %vm2301_vm7 = vcmp.lt.f32.partialorder %v342_v12, 0.0004427343  ;;  %1597 = vlog2.f32 %v561_v14  ;;  %v564_v21 = vmul.f32 -0.5, %v1588_v42  ;;  %v685_v3 = vld [vmem:[%s3038_s1 + $0x8] sm:$0xff] }
  0x64   :  { %v757_v25 = vmul.f32 %v725_v59, %v661_v63  ;;  %v329_v33 = vmul.f32 0.6931472, %v1592_v37  ;;  %v341_v26 = vmul.f32 %v1584_v55, %v340_v19  ;;  %v567_v2 = vand.u32 2147483647, %v1588_v42  ;;  %v720_v63 = vld [vmem:[%s3037_s3 + $0x20] sm:$0xff] }
  0x65   :  { %v1594_v30 = vpop.eup %1593  ;;  %v632_v34 = vsel %vm120_vm0, %v2166_v29, %v600_v32  ;;  %v565_v35 = vadd.f32 1.0, %v564_v21  ;;  %v570_v47 = vadd.f32 1.0, %v2290_v16  ;;  %v573_v40 = vmul.f32 -0.5, %v2290_v16 }
  0x66   :  { %v789_v43 = vadd.f32 %v757_v25, %v693_v11  ;;  %v664_v27 = vadd.f32 1e-06, %v632_v34  ;;  %v335_v44 = vsel %vm2271_vm3, %v332_v17, %v329_v33  ;;  %v311_v45 = vmul.f32 0.6931472, %v1594_v30 }
  0x67   :  { %v591_v29 = vadd.f32 %v335_v44, %v79_v61  ;;  %v566_v48 = vmul.f32 %v1588_v42, %v565_v35  ;;  %vm2321_vm8 = vcmp.lt.f32.partialorder %v567_v2, 0.0004427343  ;;  %1599 = vlog2.f32 %v570_v47  ;;  %v713_v2 = vld [vmem:[%s3038_s1 + $0xe8] sm:$0xff] }
  0x68   :  { %v1596_v36 = vpop.eup %1595  ;;  %1289 = vmatpush.xpose.msrb.mxu1 %v789_v43  ;;  %v760_v28 = vmul.f32 %v728_v5, %v664_v27  ;;  %v317_v41 = vsel %vm2279_vm5, %v314_v22, %v311_v45  ;;  %v574_v50 = vadd.f32 1.0, %v573_v40  ;;  %v576_v51 = vand.u32 2147483647, %v2290_v16  ;;  %v1245_v43 = vld [vmem:[%s3039_s0 + $0x8] sm:$0xff]  ;;  %v746_v45 = vld [vmem:[%s3037_s3 + $0xf0] sm:$0xff] }
  0x69   :  { %v1598_v52 = vpop.eup %1597  ;;  %v623_v61 = vsel %vm111_vm2, %v2187_v39, %v591_v29  ;;  %v589_v54 = vadd.f32 %v317_v41, %v77_v6  ;;  %v338_v55 = vmul.f32 0.6931472, %v1596_v36  ;;  %v298_v31 = vmul.f32 1.442695, %v235_v20  ;;  %v687_v39 = vld [vmem:[%s3038_s1 + $0x18] sm:$0xff]  ;;  %v717_v20 = vld [vmem:[%s3037_s3 + $0x8] sm:$0xff] }
  0x6a   :  { %v792_v18 = vadd.f32 %v760_v28, %v696_v46  ;;  %v655_v58 = vadd.f32 1e-06, %v623_v61  ;;  %vm137_vm9 = vcmp.ne.f32.partialorder %v2217_v56, %v2217_v56  ;;  %v563_v57 = vmul.f32 0.6931472, %v1598_v52  ;;  %v2415_v29 = vld [vmem:[%s3036_s2 + $0xb8] sm:$0xff]  ;;  %v2420_v36 = vld [vmem:[%s3036_s2 + $0x68] sm:$0xff] }
  0x6b   :  { %v621_v6 = vsel %vm109_vm4, %v2199_v8, %v589_v54  ;;  %v344_v17 = vsel %vm2301_vm7, %v341_v26, %v338_v55  ;;  %v575_v24 = vmul.f32 %v2290_v16, %v574_v50  ;;  %1601 = vpow2.f32 %v298_v31  ;;  %v1248_v41 = vld [vmem:[%s3039_s0 + $0x20] sm:$0xff]  ;;  %v2437_v54 = vld [vmem:[%s3036_s2 + $0x78] sm:$0xff] }
  0x6c   :  { %1349 = vmatpush.xpose.msrb.mxu2 %v792_v18  ;;  %v751_v42 = vmul.f32 %v719_v53, %v655_v58  ;;  %v653_v62 = vadd.f32 1e-06, %v621_v6  ;;  %v592_v0 = vadd.f32 %v344_v17, %v80_v15  ;;  %v569_v1 = vsel %vm2321_vm8, %v566_v48, %v563_v57 }
  0x6d   :  { %v1600_v8 = vpop.eup %1599  ;;  %v617_v10 = vadd.f32 %v569_v1, %v105_v23  ;;  %v106_v59 = vmax.f32 %v2234_v7, 0.0  ;;  %vm2367_vm10 = vcmp.lt.f32.partialorder %v576_v51, 0.0004427343  ;;  %v193_v12 = vand.u32 2147483647, %v2342_v60  ;;  %v2431_v51 = vld [vmem:[%s3036_s2 + $0x70] sm:$0xff] }
  0x6e   :  { %v783_v15 = vadd.f32 %v751_v42, %v687_v39  ;;  %v749_v14 = vmul.f32 %v717_v20, %v653_v62  ;;  %v624_v16 = vsel %vm112_vm6, %v2208_v9, %v592_v0  ;;  %v572_v23 = vmul.f32 0.6931472, %v1600_v8  ;;  %v745_v9 = vld [vmem:[%s3037_s3 + $0xe8] sm:$0xff] }
  0x6f   :  { %v656_v19 = vadd.f32 1e-06, %v624_v16  ;;  %v649_v37 = vsel %vm137_vm9, %v2217_v56, %v617_v10  ;;  %v225_v11 = vsub.f32 0.0, %v193_v12  ;;  %vm138_vm11 = vcmp.ne.f32.partialorder %v2234_v7, %v2234_v7  ;;  %v1247_v56 = vld [vmem:[%s3039_s0 + $0x18] sm:$0xff] }
  0x70   :  { %1330 = vmatpush.xpose.msra.mxu3 %v783_v15  ;;  %v781_v32 = vadd.f32 %v749_v14, %v685_v3  ;;  %v681_v21 = vadd.f32 1e-06, %v649_v37  ;;  %v578_v25 = vsel %vm2367_vm10, %v575_v24, %v572_v23  ;;  %v194_v5 = vand.u32 2147483647, %v2382_v4  ;;  %v2455_v14 = vld [vmem:[%s3036_s2 + $0x28] sm:$0xff] }
  0x71   :  { %v1602_v33 = vpop.eup %1601  ;;  %v752_v26 = vmul.f32 %v720_v63, %v656_v19  ;;  %v618_v30 = vadd.f32 %v578_v25, %v106_v59  ;;  %v278_v34 = vmul.f32 1.442695, %v225_v11  ;;  %v195_v53 = vand.u32 2147483647, %v2415_v29 }
  0x72   :  { %1290 = vmatpush.xpose.msrb.mxu1 %v781_v32  ;;  %v777_v35 = vmul.f32 %v745_v9, %v681_v21  ;;  %v579_v47 = vadd.f32 1.0, %v1602_v33  ;;  %v582_v40 = vmul.f32 -0.5, %v1602_v33  ;;  %v226_v46 = vsub.f32 0.0, %v194_v5  ;;  %v715_v5 = vld [vmem:[%s3038_s1 + $0xf8] sm:$0xff] }
  0x73   :  { %v784_v27 = vadd.f32 %v752_v26, %v688_v13  ;;  %v650_v44 = vsel %vm138_vm11, %v2234_v7, %v618_v30  ;;  %1331 = vmatmul.f32.vlgmr.msra.gmra.mxu3 %v1247_v56  ;;  %1603 = vpow2.f32 %v278_v34  ;;  %v714_v7 = vld [vmem:[%s3038_s1 + $0xf0] sm:$0xff]  ;;  %v585_v61 = vand.u32 2147483647, %v1602_v33  ;;  %v747_v26 = vld [vmem:[%s3037_s3 + $0xf8] sm:$0xff] }
  0x74   :  { %v809_v48 = vadd.f32 %v777_v35, %v713_v2  ;;  %v682_v49 = vadd.f32 1e-06, %v650_v44  ;;  %1605 = vlog2.f32 %v579_v47  ;;  %v583_v28 = vadd.f32 1.0, %v582_v40  ;;  %v2466_v56 = vld [vmem:[%s3036_s2 + $0x30] sm:$0xff]  ;;  %v2489_v44 = vld [vmem:[%s3036_s2 + $0x38] sm:$0xff] }
  0x75   :  { %1350 = vmatpush.xpose.msrb.mxu2 %v784_v27  ;;  %1291 = vmatmul.f32.vlgmr.msrb.gmra.mxu1 %v1245_v43  ;;  %v280_v50 = vmul.f32 1.442695, %v226_v46  ;;  %v185_v55 = vand.u32 2147483647, %v2420_v36  ;;  %v107_v18 = vmax.f32 %v2258_v38, 0.0  ;;  %v227_v58 = vsub.f32 0.0, %v195_v53 }
  0x76   :  { %1367 = vmatpush.xpose.msra.mxu1 %v809_v48  ;;  %v778_v52 = vmul.f32 %v746_v45, %v682_v49  ;;  %v186_v57 = vand.u32 2147483647, %v2431_v51  ;;  %vm139_vm12 = vcmp.ne.f32.partialorder %v2258_v38, %v2258_v38  ;;  %v584_v6 = vmul.f32 %v1602_v33, %v583_v28 }
  0x77   :  { %1607 = vpow2.f32 %v280_v50  ;;  %v217_v20 = vsub.f32 0.0, %v185_v55  ;;  %v187_v17 = vand.u32 2147483647, %v2437_v54  ;;  %vm2445_vm13 = vcmp.lt.f32.partialorder %v585_v61, 0.0004427343 }
  0x78   :  { %v810_v31 = vadd.f32 %v778_v52, %v714_v7  ;;  %1351 = vmatmul.f32.vlgmr.msrb.gmra.mxu2 %v1248_v41  ;;  %v282_v1 = vmul.f32 1.442695, %v227_v58  ;;  %v97_v3 = vmax.f32 %v2342_v60, 0.0  ;;  %v218_v59 = vsub.f32 0.0, %v186_v57 }
  0x79   :  { %v1604_v39 = vpop.eup %1603  ;;  %v262_v10 = vmul.f32 1.442695, %v217_v20  ;;  %v98_v22 = vmax.f32 %v2382_v4, 0.0  ;;  %v99_v12 = vmax.f32 %v2415_v29, 0.0  ;;  %v219_v15 = vsub.f32 0.0, %v187_v17 }
  0x7a   :  { %v1606_v24 = vpop.eup %1605  ;;  %1387 = vmatpush.xpose.msra.mxu2 %v810_v31  ;;  %v489_v62 = vadd.f32 1.0, %v1604_v39  ;;  %v492_v0 = vmul.f32 -0.5, %v1604_v39  ;;  %vm129_vm14 = vcmp.ne.f32.partialorder %v2342_v60, %v2342_v60  ;;  %v264_v19 = vmul.f32 1.442695, %v218_v59 }
  0x7b   :  { %v581_v8 = vmul.f32 0.6931472, %v1606_v24  ;;  %v495_v9 = vand.u32 2147483647, %v1604_v39  ;;  %v89_v13 = vmax.f32 %v2420_v36, 0.0  ;;  %vm130_vm15 = vcmp.ne.f32.partialorder %v2382_v4, %v2382_v4 }
  0x7c   :  { %1609 = vlog2.f32 %v489_v62  ;;  %v493_v23 = vadd.f32 1.0, %v492_v0  ;;  %v266_v21 = vmul.f32 1.442695, %v219_v15  ;;  %v177_v25 = vand.u32 2147483647, %v2455_v14 }
  0x7d   :  { %v1608_v16 = vpop.eup %1607  ;;  %v587_v63 = vsel %vm2445_vm13, %v584_v6, %v581_v8  ;;  %1611 = vpow2.f32 %v282_v1  ;;  %vm2480_vm0 = vcmp.lt.f32.partialorder %v495_v9, 0.0004427343  ;;  %v90_v43 = vmax.f32 %v2431_v51, 0.0  ;;  %v737_v1 = vld [vmem:[%s3037_s3 + $0xa8] sm:$0xff] }
  0x7e   :  { %v619_v37 = vadd.f32 %v587_v63, %v107_v18  ;;  %v498_v11 = vadd.f32 1.0, %v1608_v16  ;;  %v501_v32 = vmul.f32 -0.5, %v1608_v16  ;;  %1613 = vpow2.f32 %v262_v10  ;;  %v705_v63 = vld [vmem:[%s3038_s1 + $0xa8] sm:$0xff] }
  0x7f   :  { %v504_v30 = vand.u32 2147483647, %v1608_v16  ;;  %v494_v35 = vmul.f32 %v1604_v39, %v493_v23  ;;  %v209_v47 = vsub.f32 0.0, %v177_v25  ;;  %v178_v27 = vand.u32 2147483647, %v2466_v56 }
  0x80   :  { %v651_v33 = vsel %vm139_vm12, %v2258_v38, %v619_v37  ;;  %1615 = vlog2.f32 %v498_v11  ;;  %v502_v2 = vadd.f32 1.0, %v501_v32  ;;  %v91_v49 = vmax.f32 %v2437_v54, 0.0 }
  0x81   :  { %v683_v34 = vadd.f32 1e-06, %v651_v33  ;;  %1617 = vpow2.f32 %v264_v19  ;;  %v246_v7 = vmul.f32 1.442695, %v209_v47  ;;  %vm2492_vm1 = vcmp.lt.f32.partialorder %v504_v30, 0.0004427343 }
  0x82   :  { %v1610_v40 = vpop.eup %1609  ;;  %1619 = vpow2.f32 %v266_v21  ;;  %v503_v28 = vmul.f32 %v1608_v16, %v502_v2  ;;  %v179_v31 = vand.u32 2147483647, %v2489_v44  ;;  %v2499_v39 = vsub.f32 0.0, %v178_v27  ;;  %v738_v33 = vld [vmem:[%s3037_s3 + $0xb0] sm:$0xff] }
  0x83   :  { %v1612_v45 = vpop.eup %1611  ;;  %v779_v46 = vmul.f32 %v747_v26, %v683_v34  ;;  %v491_v48 = vmul.f32 0.6931472, %v1610_v40  ;;  %1621 = vpow2.f32 %v246_v7  ;;  %vm131_vm2 = vcmp.ne.f32.partialorder %v2415_v29, %v2415_v29  ;;  %v706_v40 = vld [vmem:[%s3038_s1 + $0xb0] sm:$0xff] }
  0x84   :  { %v507_v50 = vadd.f32 1.0, %v1612_v45  ;;  %v510_v52 = vmul.f32 -0.5, %v1612_v45  ;;  %v1614_v61 = vpop.eup %1613  ;;  %v513_v57 = vand.u32 2147483647, %v1612_v45  ;;  %vm121_vm3 = vcmp.ne.f32.partialorder %v2420_v36, %v2420_v36 }
  0x85   :  { %v811_v53 = vadd.f32 %v779_v46, %v715_v5  ;;  %v497_v55 = vsel %vm2480_vm0, %v494_v35, %v491_v48  ;;  %v417_v24 = vadd.f32 1.0, %v1614_v61  ;;  %v420_v42 = vmul.f32 -0.5, %v1614_v61 }
  0x86   :  { %v1616_v18 = vpop.eup %1615  ;;  %v609_v58 = vadd.f32 %v497_v55, %v97_v3  ;;  %1623 = vlog2.f32 %v507_v50  ;;  %v511_v17 = vadd.f32 1.0, %v510_v52  ;;  %v423_v8 = vand.u32 2147483647, %v1614_v61 }
  0x87   :  { %v1618_v6 = vpop.eup %1617  ;;  %1407 = vmatpush.xpose.msrb.mxu3 %v811_v53  ;;  %v500_v20 = vmul.f32 0.6931472, %v1616_v18  ;;  %1625 = vlog2.f32 %v417_v24  ;;  %v421_v16 = vadd.f32 1.0, %v420_v42  ;;  %v211_v19 = vsub.f32 0.0, %v179_v31 }
  0x88   :  { %v2503_v62 = vpop.eup %1619  ;;  %v641_v0 = vsel %vm129_vm14, %v2342_v60, %v609_v58  ;;  %v426_v3 = vadd.f32 1.0, %v1618_v6  ;;  %v429_v10 = vmul.f32 -0.5, %v1618_v6  ;;  %v512_v11 = vmul.f32 %v1612_v45, %v511_v17 }
  0x89   :  { %v673_v59 = vadd.f32 1e-06, %v641_v0  ;;  %v506_v15 = vsel %vm2492_vm1, %v503_v28, %v500_v20  ;;  %v2521_v37 = vpop.eup %1621  ;;  %vm2523_vm4 = vcmp.lt.f32.partialorder %v513_v57, 0.0004427343  ;;  %vm122_vm5 = vcmp.ne.f32.partialorder %v2431_v51, %v2431_v51 }
  0x8a   :  { %v610_v60 = vadd.f32 %v506_v15, %v98_v22  ;;  %1627 = vlog2.f32 %v426_v3  ;;  %v430_v23 = vadd.f32 1.0, %v429_v10  ;;  %v435_v21 = vadd.f32 1.0, %v2503_v62  ;;  %v729_v10 = vld [vmem:[%s3037_s3 + $0x68] sm:$0xff] }
  0x8b   :  { %v769_v9 = vmul.f32 %v737_v1, %v673_v59  ;;  %vm2537_vm6 = vcmp.lt.f32.partialorder %v423_v8, 0.0004427343  ;;  %v432_v2 = vand.u32 2147483647, %v1618_v6  ;;  %v438_v30 = vmul.f32 -0.5, %v2503_v62  ;;  %v707_v1 = vld [vmem:[%s3038_s1 + $0xb8] sm:$0xff] }
  0x8c   :  { %v1624_v22 = vpop.eup %1623  ;;  %v642_v25 = vsel %vm130_vm15, %v2382_v4, %v610_v60  ;;  %v422_v47 = vmul.f32 %v1614_v61, %v421_v16  ;;  %v431_v4 = vmul.f32 %v1618_v6, %v430_v23  ;;  %1629 = vlog2.f32 %v435_v21  ;;  %v730_v60 = vld [vmem:[%s3037_s3 + $0x70] sm:$0xff]  ;;  %v2606_v23 = vld [vmem:[%s3040_s8 + $0x78] sm:$0xff] }
  0x8d   :  { %v801_v34 = vadd.f32 %v769_v9, %v705_v63  ;;  %v674_v5 = vadd.f32 1e-06, %v642_v25  ;;  %v509_v35 = vmul.f32 0.6931472, %v1624_v22  ;;  %v441_v38 = vand.u32 2147483647, %v2503_v62  ;;  %v1626_v45 = vpop.eup %1625 }
  0x8e   :  { %v345_v27 = vadd.f32 1.0, %v2521_v37  ;;  %vm123_vm7 = vcmp.ne.f32.partialorder %v2437_v54, %v2437_v54  ;;  %v439_v7 = vadd.f32 1.0, %v438_v30  ;;  %v348_v28 = vmul.f32 -0.5, %v2521_v37  ;;  %v698_v21 = vld [vmem:[%s3038_s1 + $0x70] sm:$0xff] }
  0x8f   :  { %1368 = vmatpush.xpose.msra.mxu1 %v801_v34  ;;  %v770_v46 = vmul.f32 %v738_v33, %v674_v5  ;;  %v515_v48 = vsel %vm2523_vm4, %v512_v11, %v509_v35  ;;  %v419_v52 = vmul.f32 0.6931472, %v1626_v45  ;;  %vm2554_vm8 = vcmp.lt.f32.partialorder %v432_v2, 0.0004427343 }
  0x90   :  { %v1628_v41 = vpop.eup %1627  ;;  %v611_v50 = vadd.f32 %v515_v48, %v99_v12  ;;  %1631 = vlog2.f32 %v345_v27  ;;  %v81_v31 = vmax.f32 %v2455_v14, 0.0  ;;  %v349_v18 = vadd.f32 1.0, %v348_v28  ;;  %v739_v12 = vld [vmem:[%s3037_s3 + $0xb8] sm:$0xff]  ;;  %v689_v28 = vld [vmem:[%s3038_s1 + $0x28] sm:$0xff] }
  0x91   :  { %v802_v53 = vadd.f32 %v770_v46, %v706_v40  ;;  %v428_v55 = vmul.f32 0.6931472, %v1628_v41  ;;  %v425_v57 = vsel %vm2537_vm6, %v422_v47, %v419_v52  ;;  %v351_v6 = vand.u32 2147483647, %v2521_v37  ;;  %v699_v27 = vld [vmem:[%s3038_s1 + $0x78] sm:$0xff] }
  0x92   :  { %v643_v58 = vsel %vm131_vm2, %v2415_v29, %v611_v50  ;;  %v248_v20 = vmul.f32 1.442695, %v2499_v39  ;;  %v601_v24 = vadd.f32 %v425_v57, %v89_v13  ;;  %v440_v29 = vmul.f32 %v2503_v62, %v439_v7  ;;  %v1630_v0 = vpop.eup %1629 }
  0x93   :  { %1388 = vmatpush.xpose.msra.mxu2 %v802_v53  ;;  %v675_v17 = vadd.f32 1e-06, %v643_v58  ;;  %v434_v42 = vsel %vm2554_vm8, %v431_v4, %v428_v55  ;;  %vm2580_vm9 = vcmp.lt.f32.partialorder %v441_v38, 0.0004427343  ;;  %v250_v3 = vmul.f32 1.442695, %v211_v19 }
  0x94   :  { %v602_v8 = vadd.f32 %v434_v42, %v90_v43  ;;  %1633 = vpow2.f32 %v248_v20  ;;  %v633_v62 = vsel %vm121_vm3, %v2420_v36, %v601_v24  ;;  %v437_v59 = vmul.f32 0.6931472, %v1630_v0  ;;  %v1249_v42 = vld [vmem:[%s3039_s0 + $0x28] sm:$0xff] }
  0x95   :  { %v771_v13 = vmul.f32 %v739_v12, %v675_v17  ;;  %v350_v15 = vmul.f32 %v2521_v37, %v349_v18  ;;  %v665_v16 = vadd.f32 1e-06, %v633_v62  ;;  %vm2599_vm10 = vcmp.lt.f32.partialorder %v351_v6, 0.0004427343  ;;  %v697_v37 = vld [vmem:[%s3038_s1 + $0x68] sm:$0xff] }
  0x96   :  { %v1632_v43 = vpop.eup %1631  ;;  %v634_v63 = vsel %vm122_vm5, %v2431_v51, %v602_v8  ;;  %1635 = vpow2.f32 %v250_v3  ;;  %v443_v9 = vsel %vm2580_vm9, %v440_v29, %v437_v59  ;;  %vm113_vm11 = vcmp.ne.f32.partialorder %v2455_v14, %v2455_v14  ;;  %v2657_v0 = vld [vmem:[%s3040_s8 + $0x68] sm:$0xff] }
  0x97   :  { %v803_v19 = vadd.f32 %v771_v13, %v707_v1  ;;  %v666_v51 = vadd.f32 1e-06, %v634_v63  ;;  %v347_v11 = vmul.f32 0.6931472, %v1632_v43  ;;  %v761_v32 = vmul.f32 %v729_v10, %v665_v16 }
  0x98   :  { %v603_v22 = vadd.f32 %v443_v9, %v91_v49  ;;  %v915_v26 = vand.u32 2147483647, %v2606_v23  ;;  %v731_v49 = vld [vmem:[%s3037_s3 + $0x78] sm:$0xff]  ;;  %v82_v17 = vmax.f32 %v2466_v56, 0.0  ;;  %v913_v8 = vand.u32 2147483647, %v2657_v0 }
  0x99   :  { %1408 = vmatpush.xpose.msrb.mxu3 %v803_v19  ;;  %v762_v25 = vmul.f32 %v730_v60, %v666_v51  ;;  %v353_v33 = vsel %vm2599_vm10, %v350_v15, %v347_v11  ;;  %v793_v30 = vadd.f32 %v761_v32, %v697_v37  ;;  %vm114_vm13 = vcmp.ne.f32.partialorder %v2466_v56, %v2466_v56  ;;  %v2672_v37 = vld [vmem:[%s3040_s8 + $0x60] sm:$0xff]  ;;  %v722_v9 = vld [vmem:[%s3037_s3 + $0x30] sm:$0xff] }
  0x9a   :  { %v1634_v2 = vpop.eup %1633  ;;  %v635_v34 = vsel %vm123_vm7, %v2437_v54, %v603_v22  ;;  %v593_v5 = vadd.f32 %v353_v33, %v81_v31  ;;  %v721_v54 = vld [vmem:[%s3037_s3 + $0x28] sm:$0xff]  ;;  %v931_v46 = vsub.f32 0.0, %v915_v26  ;;  %v83_v10 = vmax.f32 %v2489_v44, 0.0  ;;  %v690_v22 = vld [vmem:[%s3038_s1 + $0x30] sm:$0xff] }
  0x9b   :  { %v794_v35 = vadd.f32 %v762_v25, %v698_v21  ;;  %v667_v47 = vadd.f32 1e-06, %v635_v34  ;;  %v354_v40 = vadd.f32 1.0, %v1634_v2  ;;  %v357_v4 = vmul.f32 -0.5, %v1634_v2  ;;  %1369 = vmatpush.xpose.msra.mxu1 %v793_v30 }
  0x9c   :  { %v1636_v38 = vpop.eup %1635  ;;  %v625_v45 = vsel %vm113_vm11, %v2455_v14, %v593_v5  ;;  %v2643_v14 = vld [vmem:[%s3040_s8 + $0x70] sm:$0xff]  ;;  %v360_v55 = vand.u32 2147483647, %v1634_v2  ;;  %v962_v31 = vmul.f32 1.442695, %v931_v46  ;;  %v929_v15 = vsub.f32 0.0, %v913_v8 }
  0x9d   :  { %1389 = vmatpush.xpose.msra.mxu2 %v794_v35  ;;  %v763_v48 = vmul.f32 %v731_v49, %v667_v47  ;;  %v657_v7 = vadd.f32 1e-06, %v625_v45  ;;  %1637 = vlog2.f32 %v354_v40  ;;  %v358_v41 = vadd.f32 1.0, %v357_v4  ;;  %v2696_v35 = vld [vmem:[%s3040_s8 + $0x58] sm:$0xff]  ;;  %v1250_v46 = vld [vmem:[%s3039_s0 + $0x30] sm:$0xff] }
  0x9e   :  { %v363_v50 = vadd.f32 1.0, %v1636_v38  ;;  %v366_v52 = vmul.f32 -0.5, %v1636_v38  ;;  %v914_v12 = vand.u32 2147483647, %v2643_v14  ;;  %v369_v6 = vand.u32 2147483647, %v1636_v38 }
  0x9f   :  { %v795_v61 = vadd.f32 %v763_v48, %v699_v27  ;;  %v753_v53 = vmul.f32 %v721_v54, %v657_v7  ;;  %v359_v57 = vmul.f32 %v1634_v2, %v358_v41  ;;  %vm2647_vm12 = vcmp.lt.f32.partialorder %v360_v55, 0.0004427343  ;;  %v723_v2 = vld [vmem:[%s3037_s3 + $0x38] sm:$0xff]  ;;  %v1185_v7 = vld [vmem:[%s3041_s9 + $0x68] sm:$0xff] }
  0xa0   :  { %1639 = vlog2.f32 %v363_v50  ;;  %v367_v58 = vadd.f32 1.0, %v366_v52  ;;  %v930_v29 = vsub.f32 0.0, %v914_v12  ;;  %vm2665_vm14 = vcmp.lt.f32.partialorder %v369_v6, 0.0004427343  ;;  %v691_v40 = vld [vmem:[%s3038_s1 + $0x38] sm:$0xff] }
  0xa1   :  { %1409 = vmatpush.xpose.msrb.mxu3 %v795_v61  ;;  %v785_v18 = vadd.f32 %v753_v53, %v689_v28  ;;  %1641 = vpow2.f32 %v962_v31  ;;  %v958_v19 = vmul.f32 1.442695, %v929_v15  ;;  %vm115_vm15 = vcmp.ne.f32.partialorder %v2489_v44, %v2489_v44  ;;  %v1187_v8 = vld [vmem:[%s3041_s9 + $0x78] sm:$0xff] }
  0xa2   :  { %v368_v39 = vmul.f32 %v1636_v38, %v367_v58  ;;  %v960_v3 = vmul.f32 1.442695, %v930_v29  ;;  %v867_v48 = vmax.f32 %v2606_v23, 0.0  ;;  %v911_v28 = vand.u32 2147483647, %v2696_v35 }
  0xa3   :  { %v1638_v20 = vpop.eup %1637  ;;  %1370 = vmatpush.xpose.msra.mxu1 %v785_v18  ;;  %v1251_v18 = vld [vmem:[%s3039_s0 + $0x38] sm:$0xff]  ;;  %vm883_vm1 = vcmp.ne.f32.partialorder %v2606_v23, %v2606_v23  ;;  %vm1419_vm2 = vcmask 261120   ;;  %vm882_vm4 = vcmp.ne.f32.partialorder %v2643_v14, %v2643_v14  ;;  %vm881_vm6 = vcmp.ne.f32.partialorder %v2657_v0, %v2657_v0 }
  0xa4   :  { %v356_v1 = vmul.f32 0.6931472, %v1638_v20  ;;  %1643 = vpow2.f32 %v960_v3  ;;  %v927_v12 = vsub.f32 0.0, %v911_v28  ;;  %vm880_vm8 = vcmp.ne.f32.partialorder %v2672_v37, %v2672_v37  ;;  %v1184_v3 = vld [vmem:[%s3041_s9 + $0x60] sm:$0xff] }
  0xa5   :  { %vm879_vm10 = vcmp.ne.f32.partialorder %v2696_v35, %v2696_v35 }
  0xa6   :  { %v1640_v13 = vpop.eup %1639  ;;  %v362_v62 = vsel %vm2647_vm12, %v359_v57, %v356_v1  ;;  %1371 = vmatmul.f32.vlgmr.msra.gmra.mxu1 %v1249_v42  ;;  %v2720_v57 = vld [vmem:[%s3040_s8 + $0x50] sm:$0xff]  ;;  %v954_v24 = vmul.f32 1.442695, %v927_v12 }
  0xa7   :  { %v1642_v43 = vpop.eup %1641  ;;  %v594_v16 = vadd.f32 %v362_v62, %v82_v17  ;;  %v365_v63 = vmul.f32 0.6931472, %v1640_v13  ;;  %v910_v42 = vand.u32 2147483647, %v2720_v57  ;;  %vm878_vm12 = vcmp.ne.f32.partialorder %v2720_v57, %v2720_v57 }
  0xa8   :  { %v1099_v60 = vadd.f32 1.0, %v1642_v43  ;;  %v1102_v36 = vmul.f32 -0.5, %v1642_v43  ;;  %v1105_v30 = vand.u32 2147483647, %v1642_v43 }
  0xa9   :  { %v626_v51 = vsel %vm114_vm13, %v2466_v56, %v594_v16  ;;  %v371_v11 = vsel %vm2665_vm14, %v368_v39, %v365_v63  ;;  %v912_v56 = vand.u32 2147483647, %v2672_v37  ;;  %v866_v39 = vmax.f32 %v2643_v14, 0.0 }
  0xaa   :  { %v658_v32 = vadd.f32 1e-06, %v626_v51  ;;  %v595_v21 = vadd.f32 %v371_v11, %v83_v10  ;;  %1645 = vlog2.f32 %v1099_v60  ;;  %v1103_v25 = vadd.f32 1.0, %v1102_v36  ;;  %v1644_v34 = vpop.eup %1643  ;;  %v2741_v60 = vld [vmem:[%s3040_s8 + $0x48] sm:$0xff] }
  0xab   :  { %1647 = vpow2.f32 %v958_v19  ;;  %v928_v5 = vsub.f32 0.0, %v912_v56  ;;  %v1090_v4 = vadd.f32 1.0, %v1644_v34  ;;  %vm2705_vm0 = vcmp.lt.f32.partialorder %v1105_v30, 0.0004427343 }
  0xac   :  { %v754_v33 = vmul.f32 %v722_v9, %v658_v32  ;;  %v627_v26 = vsel %vm115_vm15, %v2489_v44, %v595_v21  ;;  %v1093_v44 = vmul.f32 -0.5, %v1644_v34  ;;  %v1104_v27 = vmul.f32 %v1642_v43, %v1103_v25 }
  0xad   :  { %v659_v49 = vadd.f32 1e-06, %v627_v26  ;;  %v956_v45 = vmul.f32 1.442695, %v928_v5  ;;  %1649 = vlog2.f32 %v1090_v4  ;;  %v1096_v53 = vand.u32 2147483647, %v1644_v34 }
  0xae   :  { %v786_v47 = vadd.f32 %v754_v33, %v690_v22  ;;  %v1094_v61 = vadd.f32 1.0, %v1093_v44  ;;  %v926_v15 = vsub.f32 0.0, %v910_v42  ;;  %v865_v43 = vmax.f32 %v2657_v0, 0.0 }
  0xaf   :  { %v755_v38 = vmul.f32 %v723_v2, %v659_v49  ;;  %1651 = vpow2.f32 %v956_v45  ;;  %vm2728_vm3 = vcmp.lt.f32.partialorder %v1096_v53, 0.0004427343  ;;  %v909_v33 = vand.u32 2147483647, %v2741_v60  ;;  %v1186_v2 = vld [vmem:[%s3041_s9 + $0x70] sm:$0xff] }
  0xb0   :  { %v1646_v54 = vpop.eup %1645  ;;  %1390 = vmatpush.xpose.msra.mxu2 %v786_v47  ;;  %v1095_v20 = vmul.f32 %v1644_v34, %v1094_v61  ;;  %v952_v9 = vmul.f32 1.442695, %v926_v15  ;;  %vm877_vm14 = vcmp.ne.f32.partialorder %v2741_v60, %v2741_v60 }
  0xb1   :  { %v1648_v41 = vpop.eup %1647  ;;  %v787_v50 = vadd.f32 %v755_v38, %v691_v40  ;;  %v1101_v52 = vmul.f32 0.6931472, %v1646_v54  ;;  %v925_v47 = vsub.f32 0.0, %v909_v33  ;;  %v1183_v33 = vld [vmem:[%s3041_s9 + $0x58] sm:$0xff] }
  0xb2   :  { %v1081_v55 = vadd.f32 1.0, %v1648_v41  ;;  %v1084_v31 = vmul.f32 -0.5, %v1648_v41  ;;  %v1087_v13 = vand.u32 2147483647, %v1648_v41 }
  0xb3   :  { %1410 = vmatpush.xpose.msrb.mxu3 %v787_v50  ;;  %1391 = vmatmul.f32.vlgmr.msra.gmra.mxu2 %v1250_v46  ;;  %v1107_v58 = vsel %vm2705_vm0, %v1104_v27, %v1101_v52  ;;  %v1650_v29 = vpop.eup %1649  ;;  %v864_v27 = vmax.f32 %v2672_v37, 0.0  ;;  %v950_v54 = vmul.f32 1.442695, %v925_v47  ;;  %v2777_v50 = vld [vmem:[%s3040_s8 + $0x40] sm:$0xff] }
  0xb4   :  { %v1123_v6 = vadd.f32 %v1107_v58, %v867_v48  ;;  %1653 = vlog2.f32 %v1081_v55  ;;  %v1085_v17 = vadd.f32 1.0, %v1084_v31  ;;  %v1092_v59 = vmul.f32 0.6931472, %v1650_v29 }
  0xb5   :  { %v1652_v62 = vpop.eup %1651  ;;  %1655 = vpow2.f32 %v954_v24  ;;  %vm2745_vm5 = vcmp.lt.f32.partialorder %v1087_v13, 0.0004427343  ;;  %v863_v13 = vmax.f32 %v2696_v35, 0.0  ;;  %vm876_vm0 = vcmp.ne.f32.partialorder %v2777_v50, %v2777_v50 }
  0xb6   :  { %1411 = vmatmul.f32.vlgmr.msrb.gmra.mxu3 %v1251_v18  ;;  %v1139_v1 = vsel %vm883_vm1, %v2606_v23, %v1123_v6  ;;  %v1171_v23 = vld [vmem:[%s3042_s7 + $0x78] sm:$0xff]  ;;  %v1072_v16 = vadd.f32 1.0, %v1652_v62  ;;  %v1075_v63 = vmul.f32 -0.5, %v1652_v62  ;;  %v1098_v19 = vsel %vm2728_vm3, %v1095_v20, %v1092_v59 }
  0xb7   :  { %v1155_v10 = vadd.f32 1e-06, %v1139_v1  ;;  %v1086_v51 = vmul.f32 %v1648_v41, %v1085_v17  ;;  %v1122_v32 = vadd.f32 %v1098_v19, %v866_v39  ;;  %v1078_v30 = vand.u32 2147483647, %v1652_v62 }
  0xb8   :  { %1657 = vlog2.f32 %v1072_v16  ;;  %v1076_v22 = vadd.f32 1.0, %v1075_v63  ;;  %v908_v20 = vand.u32 2147483647, %v2777_v50 }
  0xb9   :  { %v1203_v36 = vmul.f32 %v1187_v8, %v1155_v10  ;;  %1659 = vpow2.f32 %v952_v9  ;;  %v1138_v26 = vsel %vm882_vm4, %v2643_v14, %v1122_v32  ;;  %v1170_v14 = vld [vmem:[%s3042_s7 + $0x70] sm:$0xff]  ;;  %vm2770_vm7 = vcmp.lt.f32.partialorder %v1078_v30, 0.0004427343 }
  0xba   :  { %v1654_v11 = vpop.eup %1653  ;;  %v1154_v49 = vadd.f32 1e-06, %v1138_v26  ;;  %v1077_v45 = vmul.f32 %v1652_v62, %v1076_v22  ;;  %v924_v1 = vsub.f32 0.0, %v908_v20  ;;  %v862_v32 = vmax.f32 %v2720_v57, 0.0  ;;  %v1181_v20 = vld [vmem:[%s3041_s9 + $0x48] sm:$0xff] }
  0xbb   :  { %v1219_v25 = vadd.f32 %v1203_v36, %v1171_v23  ;;  %v1083_v56 = vmul.f32 0.6931472, %v1654_v11  ;;  %v1656_v34 = vpop.eup %1655 }
  0xbc   :  { %v1063_v4 = vadd.f32 1.0, %v1656_v34  ;;  %v1066_v44 = vmul.f32 -0.5, %v1656_v34  ;;  %v1202_v38 = vmul.f32 %v1186_v2, %v1154_v49  ;;  %v1069_v31 = vand.u32 2147483647, %v1656_v34 }
  0xbd   :  { %1496 = vmatpush.xpose.msk.msra.mxu0 %vm1419_vm2, %v1219_v25  ;;  %v1089_v5 = vsel %vm2745_vm5, %v1086_v51, %v1083_v56 }
  0xbe   :  { %v1121_v40 = vadd.f32 %v1089_v5, %v865_v43  ;;  %v1658_v46 = vpop.eup %1657  ;;  %1661 = vlog2.f32 %v1063_v4  ;;  %v1067_v41 = vadd.f32 1.0, %v1066_v44  ;;  %v1218_v61 = vadd.f32 %v1202_v38, %v1170_v14 }
  0xbf   :  { %v1660_v52 = vpop.eup %1659  ;;  %v1074_v55 = vmul.f32 0.6931472, %v1658_v46  ;;  %1663 = vpow2.f32 %v950_v54  ;;  %vm2793_vm9 = vcmp.lt.f32.partialorder %v1069_v31, 0.0004427343  ;;  %v948_v43 = vmul.f32 1.442695, %v924_v1 }
  0xc0   :  { %v1137_v48 = vsel %vm881_vm6, %v2657_v0, %v1121_v40  ;;  %v1169_v0 = vld [vmem:[%s3042_s7 + $0x68] sm:$0xff]  ;;  %v1054_v18 = vadd.f32 1.0, %v1660_v52  ;;  %v1057_v58 = vmul.f32 -0.5, %v1660_v52  ;;  %v1068_v42 = vmul.f32 %v1656_v34, %v1067_v41  ;;  %v2816_v34 = vld [vmem:[%s3040_s8 + $0x38] sm:$0xff] }
  0xc1   :  { %v1153_v53 = vadd.f32 1e-06, %v1137_v48  ;;  %1497 = vmatpush.xpose.msk.msra.mxu0 %vm1419_vm2, %v1218_v61  ;;  %v1080_v6 = vsel %vm2770_vm7, %v1077_v45, %v1074_v55  ;;  %v1060_v10 = vand.u32 2147483647, %v1660_v52  ;;  %v907_v5 = vand.u32 2147483647, %v2816_v34 }
  0xc2   :  { %v1120_v17 = vadd.f32 %v1080_v6, %v864_v27  ;;  %1665 = vlog2.f32 %v1054_v18  ;;  %v1058_v29 = vadd.f32 1.0, %v1057_v58  ;;  %v861_v40 = vmax.f32 %v2741_v60, 0.0  ;;  %v1182_v27 = vld [vmem:[%s3041_s9 + $0x50] sm:$0xff] }
  0xc3   :  { %v1201_v12 = vmul.f32 %v1185_v7, %v1153_v53  ;;  %1667 = vpow2.f32 %v948_v43  ;;  %vm1061_vm11 = vcmp.lt.f32.partialorder %v1060_v10, 0.0004427343  ;;  %v923_v41 = vsub.f32 0.0, %v907_v5  ;;  %v2885_v5 = vld [vmem:[%s3040_s8 + $0x18] sm:$0xff] }
  0xc4   :  { %v1662_v8 = vpop.eup %1661  ;;  %v1136_v39 = vsel %vm880_vm8, %v2672_v37, %v1120_v17  ;;  %v1168_v37 = vld [vmem:[%s3042_s7 + $0x60] sm:$0xff]  ;;  %v1059_v51 = vmul.f32 %v1660_v52, %v1058_v29  ;;  %v2834_v52 = vld [vmem:[%s3040_s8 + $0x30] sm:$0xff]  ;;  %v2853_v29 = vld [vmem:[%s3040_s8 + $0x28] sm:$0xff]  ;;  %v903_v45 = vand.u32 2147483647, %v2885_v5  ;;  %vm875_vm3 = vcmp.ne.f32.partialorder %v2816_v34, %v2816_v34 }
  0xc5   :  { %v1217_v24 = vadd.f32 %v1201_v12, %v1169_v0  ;;  %v1664_v59 = vpop.eup %1663  ;;  %v1152_v15 = vadd.f32 1e-06, %v1136_v39  ;;  %v1065_v23 = vmul.f32 0.6931472, %v1662_v8  ;;  %v946_v0 = vmul.f32 1.442695, %v923_v41 }
  0xc6   :  { %v1045_v16 = vadd.f32 1.0, %v1664_v59  ;;  %v1048_v63 = vmul.f32 -0.5, %v1664_v59  ;;  %v1051_v26 = vand.u32 2147483647, %v1664_v59  ;;  %v906_v58 = vand.u32 2147483647, %v2834_v52 }
  0xc7   :  { %1498 = vmatpush.xpose.msk.msra.mxu0 %vm1419_vm2, %v1217_v24  ;;  %v1200_v36 = vmul.f32 %v1184_v3, %v1152_v15  ;;  %v1071_v19 = vsel %vm2793_vm9, %v1068_v42, %v1065_v23  ;;  %v1165_v8 = vld [vmem:[%s3042_s7 + $0x48] sm:$0xff]  ;;  %v905_v62 = vand.u32 2147483647, %v2853_v29  ;;  %vm874_vm5 = vcmp.ne.f32.partialorder %v2834_v52, %v2834_v52 }
  0xc8   :  { %v1666_v9 = vpop.eup %1665  ;;  %v1119_v11 = vadd.f32 %v1071_v19, %v863_v13  ;;  %1669 = vlog2.f32 %v1045_v16  ;;  %v1049_v25 = vadd.f32 1.0, %v1048_v63  ;;  %vm2827_vm13 = vcmp.lt.f32.partialorder %v1051_v26, 0.0004427343  ;;  %v2866_v63 = vld [vmem:[%s3040_s8 + $0x20] sm:$0xff] }
  0xc9   :  { %v1216_v21 = vadd.f32 %v1200_v36, %v1168_v37  ;;  %v1056_v22 = vmul.f32 0.6931472, %v1666_v9  ;;  %v1668_v47 = vpop.eup %1667  ;;  %v922_v42 = vsub.f32 0.0, %v906_v58  ;;  %v921_v16 = vsub.f32 0.0, %v905_v62  ;;  %v1180_v19 = vld [vmem:[%s3041_s9 + $0x40] sm:$0xff] }
  0xca   :  { %v1135_v56 = vsel %vm879_vm10, %v2696_v35, %v1119_v11  ;;  %v1167_v35 = vld [vmem:[%s3042_s7 + $0x58] sm:$0xff]  ;;  %v1050_v4 = vmul.f32 %v1664_v59, %v1049_v25  ;;  %v1036_v54 = vadd.f32 1.0, %v1668_v47  ;;  %v1039_v46 = vmul.f32 -0.5, %v1668_v47 }
  0xcb   :  { %1499 = vmatpush.xpose.msk.msra.mxu0 %vm1419_vm2, %v1216_v21  ;;  %v1151_v2 = vadd.f32 1e-06, %v1135_v56  ;;  %v1062_v30 = vsel %vm1061_vm11, %v1059_v51, %v1056_v22  ;;  %v1042_v18 = vand.u32 2147483647, %v1668_v47  ;;  %v944_v13 = vmul.f32 1.442695, %v922_v42 }
  0xcc   :  { %v1118_v49 = vadd.f32 %v1062_v30, %v862_v32  ;;  %1671 = vlog2.f32 %v1036_v54  ;;  %v1040_v55 = vadd.f32 1.0, %v1039_v46  ;;  %v2875_v51 = vld [vmem:[%s3043_s5] sm:$0x1]  ;;  %v942_v32 = vmul.f32 1.442695, %v921_v16 }
  0xcd   :  { %v1199_v14 = vmul.f32 %v1183_v33, %v1151_v2  ;;  %1673 = vpow2.f32 %v946_v0  ;;  %vm1043_vm15 = vcmp.lt.f32.partialorder %v1042_v18, 0.0004427343  ;;  %v1164_v21 = vld [vmem:[%s3042_s7 + $0x40] sm:$0xff]  ;;  %v816_v33 = vand.u32 2147483647, %v2875_v51  ;;  %v1179_v0 = vld [vmem:[%s3041_s9 + $0x38] sm:$0xff] }
  0xce   :  { %v1670_v44 = vpop.eup %1669  ;;  %v1134_v38 = vsel %vm878_vm12, %v2720_v57, %v1118_v49  ;;  %v1166_v57 = vld [vmem:[%s3042_s7 + $0x50] sm:$0xff]  ;;  %v1041_v24 = vmul.f32 %v1668_v47, %v1040_v55  ;;  %1675 = vpow2.f32 %v944_v13  ;;  %vm873_vm7 = vcmp.ne.f32.partialorder %v2853_v29, %v2853_v29 }
  0xcf   :  { %v1215_v48 = vadd.f32 %v1199_v14, %v1167_v35  ;;  %v1150_v7 = vadd.f32 1e-06, %v1134_v38  ;;  %v1047_v28 = vmul.f32 0.6931472, %v1670_v44  ;;  %v859_v14 = vmax.f32 %v2816_v34, 0.0 }
  0xd0   :  { %vm872_vm9 = vcmp.ne.f32.partialorder %v2866_v63, %v2866_v63  ;;  %vm871_vm11 = vcmp.ne.f32.partialorder %v2885_v5, %v2885_v5 }
  0xd1   :  { %1500 = vmatpush.xpose.msk.msra.mxu0 %vm1419_vm2, %v1215_v48  ;;  %v1198_v61 = vmul.f32 %v1182_v27, %v1150_v7  ;;  %v1053_v53 = vsel %vm2827_vm13, %v1050_v4, %v1047_v28 }
  0xd2   :  { %v1117_v31 = vadd.f32 %v1053_v53, %v861_v40  ;;  %v1672_v1 = vpop.eup %1671  ;;  %v817_v40 = vsub.f32 0.0, %v816_v33 }
  0xd3   :  { %v1214_v12 = vadd.f32 %v1198_v61, %v1166_v57  ;;  %v1038_v3 = vmul.f32 0.6931472, %v1672_v1  ;;  %v1674_v10 = vpop.eup %1673  ;;  %v919_v61 = vsub.f32 0.0, %v903_v45  ;;  %v2946_v45 = vld [vmem:[%s3040_s8] sm:$0xff] }
  0xd4   :  { %v1133_v6 = vsel %vm877_vm14, %v2741_v60, %v1117_v31  ;;  %v860_v60 = vmax.f32 %v2777_v50, 0.0  ;;  %v1027_v43 = vadd.f32 1.0, %v1674_v10  ;;  %v1030_v37 = vmul.f32 -0.5, %v1674_v10  ;;  %v1676_v25 = vpop.eup %1675 }
  0xd5   :  { %1501 = vmatpush.xpose.msk.msra.mxu0 %vm1419_vm2, %v1214_v12  ;;  %v1149_v17 = vadd.f32 1e-06, %v1133_v6  ;;  %v1044_v15 = vsel %vm1043_vm15, %v1041_v24, %v1038_v3  ;;  %v1033_v22 = vand.u32 2147483647, %v1674_v10  ;;  %v1018_v26 = vadd.f32 1.0, %v1676_v25  ;;  %v1163_v6 = vld [vmem:[%s3042_s7 + $0x38] sm:$0xff] }
  0xd6   :  { %v1116_v23 = vadd.f32 %v1044_v15, %v860_v60  ;;  %1677 = vlog2.f32 %v1027_v43  ;;  %v1031_v11 = vadd.f32 1.0, %v1030_v37  ;;  %v1021_v2 = vmul.f32 -0.5, %v1676_v25 }
  0xd7   :  { %v1197_v39 = vmul.f32 %v1181_v20, %v1149_v17  ;;  %1679 = vpow2.f32 %v942_v32  ;;  %vm1034_vm1 = vcmp.lt.f32.partialorder %v1033_v22, 0.0004427343  ;;  %v1024_v27 = vand.u32 2147483647, %v1676_v25 }
  0xd8   :  { %v1132_v36 = vsel %vm876_vm0, %v2777_v50, %v1116_v23  ;;  %v904_v50 = vand.u32 2147483647, %v2866_v63  ;;  %v1032_v35 = vmul.f32 %v1674_v10, %v1031_v11  ;;  %1681 = vlog2.f32 %v1018_v26  ;;  %v2910_v23 = vld [vmem:[%s3040_s8 + $0x10] sm:$0xff] }
  0xd9   :  { %v1213_v59 = vadd.f32 %v1197_v39, %v1165_v8  ;;  %v1148_v9 = vadd.f32 1e-06, %v1132_v36  ;;  %v1022_v44 = vadd.f32 1.0, %v1021_v2  ;;  %v818_v41 = vmul.f32 1.442695, %v817_v40 }
  0xda   :  { %v920_v49 = vsub.f32 0.0, %v904_v50  ;;  %v858_v31 = vmax.f32 %v2834_v52, 0.0  ;;  %vm1025_vm4 = vcmp.lt.f32.partialorder %v1024_v27, 0.0004427343  ;;  %v938_v17 = vmul.f32 1.442695, %v919_v61 }
  0xdb   :  { %1502 = vmatpush.xpose.msk.msra.mxu0 %vm1419_vm2, %v1213_v59  ;;  %v1196_v56 = vmul.f32 %v1180_v19, %v1148_v9  ;;  %v1023_v57 = vmul.f32 %v1676_v25, %v1022_v44  ;;  %v857_v3 = vmax.f32 %v2853_v29, 0.0  ;;  %v1178_v59 = vld [vmem:[%s3041_s9 + $0x30] sm:$0xff]  ;;  %v902_v16 = vand.u32 2147483647, %v2910_v23  ;;  %v2925_v50 = vld [vmem:[%s3040_s8 + $0x8] sm:$0xff] }
  0xdc   :  { %v1678_v47 = vpop.eup %1677  ;;  %v940_v38 = vmul.f32 1.442695, %v920_v49  ;;  %v856_v22 = vmax.f32 %v2866_v63, 0.0  ;;  %v901_v2 = vand.u32 2147483647, %v2925_v50  ;;  %v1177_v49 = vld [vmem:[%s3041_s9 + $0x28] sm:$0xff]  ;;  %vm870_vm14 = vcmp.ne.f32.partialorder %v2910_v23, %v2910_v23 }
  0xdd   :  { %v1212_v30 = vadd.f32 %v1196_v56, %v1164_v21  ;;  %v1029_v4 = vmul.f32 0.6931472, %v1678_v47  ;;  %v1680_v54 = vpop.eup %1679  ;;  %v918_v11 = vsub.f32 0.0, %v902_v16  ;;  %v1175_v16 = vld [vmem:[%s3041_s9 + $0x18] sm:$0xff]  ;;  %vm814_vm0 = vcmp.ne.f32.partialorder %v2875_v51, %v2875_v51 }
  0xde   :  { %1683 = vpow2.f32 %v940_v38  ;;  %v1009_v7 = vadd.f32 1.0, %v1680_v54  ;;  %v1012_v28 = vmul.f32 -0.5, %v1680_v54  ;;  %v1682_v53 = vpop.eup %1681  ;;  %v1015_v20 = vand.u32 2147483647, %v1680_v54 }
  0xdf   :  { %1503 = vmatpush.xpose.msk.msra.mxu0 %vm1419_vm2, %v1212_v30  ;;  %v1035_v46 = vsel %vm1034_vm1, %v1032_v35, %v1029_v4  ;;  %v1020_v58 = vmul.f32 0.6931472, %v1682_v53  ;;  %v936_v26 = vmul.f32 1.442695, %v918_v11  ;;  %v917_v27 = vsub.f32 0.0, %v901_v2 }
  0xe0   :  { %v1115_v48 = vadd.f32 %v1035_v46, %v859_v14  ;;  %1685 = vlog2.f32 %v1009_v7  ;;  %v1013_v12 = vadd.f32 1.0, %v1012_v28  ;;  %vm1016_vm6 = vcmp.lt.f32.partialorder %v1015_v20, 0.0004427343 }
  0xe1   :  { %1687 = vpow2.f32 %v818_v41  ;;  %v900_v7 = vand.u32 2147483647, %v2946_v45  ;;  %vm869_vm1 = vcmp.ne.f32.partialorder %v2925_v50, %v2925_v50 }
  0xe2   :  { %v1131_v55 = vsel %vm875_vm3, %v2816_v34, %v1115_v48  ;;  %v1026_v34 = vsel %vm1025_vm4, %v1023_v57, %v1020_v58  ;;  %v1014_v13 = vmul.f32 %v1680_v54, %v1013_v12  ;;  %1689 = vpow2.f32 %v938_v17  ;;  %v1160_v17 = vld [vmem:[%s3042_s7 + $0x20] sm:$0xff] }
  0xe3   :  { %v1147_v18 = vadd.f32 1e-06, %v1131_v55  ;;  %v1114_v1 = vadd.f32 %v1026_v34, %v858_v31  ;;  %v934_v57 = vmul.f32 1.442695, %v917_v27  ;;  %v916_v53 = vsub.f32 0.0, %v900_v7  ;;  %v1176_v31 = vld [vmem:[%s3041_s9 + $0x20] sm:$0xff] }
  0xe4   :  { %v1684_v24 = vpop.eup %1683  ;;  %vm868_vm4 = vcmp.ne.f32.partialorder %v2946_v45, %v2946_v45 }
  0xe5   :  { %v1195_v42 = vmul.f32 %v1179_v0, %v1147_v18  ;;  %v1000_v8 = vadd.f32 1.0, %v1684_v24  ;;  %v1003_v60 = vmul.f32 -0.5, %v1684_v24  ;;  %v1130_v10 = vsel %vm874_vm5, %v2834_v52, %v1114_v1  ;;  %v1162_v52 = vld [vmem:[%s3042_s7 + $0x30] sm:$0xff] }
  0xe6   :  { %v1686_v62 = vpop.eup %1685  ;;  %v1146_v43 = vadd.f32 1e-06, %v1130_v10  ;;  %v1006_v36 = vand.u32 2147483647, %v1684_v24 }
  0xe7   :  { %v1211_v39 = vadd.f32 %v1195_v42, %v1163_v6  ;;  %1691 = vlog2.f32 %v1000_v8  ;;  %v1004_v15 = vadd.f32 1.0, %v1003_v60  ;;  %v1011_v37 = vmul.f32 0.6931472, %v1686_v62  ;;  %v2919_v32 = vpop.eup %1687 }
  0xe8   :  { %v1194_v19 = vmul.f32 %v1178_v59, %v1146_v43  ;;  %v1690_v25 = vpop.eup %1689  ;;  %vm2932_vm8 = vcmp.lt.f32.partialorder %v1006_v36, 0.0004427343  ;;  %v820_v4 = vadd.f32 1.0, %v2919_v32  ;;  %1693 = vpow2.f32 %v936_v26 }
  0xe9   :  { %1504 = vmatpush.xpose.msk.msra.mxu0 %vm1419_vm2, %v1211_v39  ;;  %v1017_v9 = vsel %vm1016_vm6, %v1014_v13, %v1011_v37  ;;  %v1005_v33 = vmul.f32 %v1684_v24, %v1004_v15  ;;  %v991_v14 = vadd.f32 1.0, %v1690_v25  ;;  %v994_v40 = vmul.f32 -0.5, %v1690_v25 }
  0xea   :  { %v1113_v21 = vadd.f32 %v1017_v9, %v857_v3  ;;  %v1210_v56 = vadd.f32 %v1194_v19, %v1162_v52  ;;  %v997_v41 = vand.u32 2147483647, %v1690_v25  ;;  %v823_v55 = vmul.f32 -0.5, %v2919_v32 }
  0xeb   :  { %1695 = vlog2.f32 %v991_v14  ;;  %v995_v48 = vadd.f32 1.0, %v994_v40  ;;  %v932_v6 = vmul.f32 1.442695, %v916_v53  ;;  %v855_v24 = vmax.f32 %v2885_v5, 0.0 }
  0xec   :  { %v1129_v35 = vsel %vm873_vm7, %v2853_v29, %v1113_v21  ;;  %v1161_v29 = vld [vmem:[%s3042_s7 + $0x28] sm:$0xff]  ;;  %1697 = vlog2.f32 %v820_v4  ;;  %vm998_vm10 = vcmp.lt.f32.partialorder %v997_v41, 0.0004427343  ;;  %v824_v1 = vadd.f32 1.0, %v823_v55 }
  0xed   :  { %v1692_v30 = vpop.eup %1691  ;;  %1505 = vmatpush.xpose.msk.msra.mxu0 %vm1419_vm2, %v1210_v56  ;;  %v1145_v44 = vadd.f32 1e-06, %v1129_v35  ;;  %1699 = vpow2.f32 %v934_v57  ;;  %v996_v12 = vmul.f32 %v1690_v25, %v995_v48  ;;  %v826_v60 = vand.u32 2147483647, %v2919_v32  ;;  %v1158_v57 = vld [vmem:[%s3042_s7 + $0x10] sm:$0xff] }
  0xee   :  { %v1002_v38 = vmul.f32 0.6931472, %v1692_v30  ;;  %v1694_v18 = vpop.eup %1693  ;;  %1701 = vpow2.f32 %v932_v6  ;;  %v825_v43 = vmul.f32 %v2919_v32, %v824_v1  ;;  %v854_v32 = vmax.f32 %v2910_v23, 0.0 }
  0xef   :  { %v1193_v54 = vmul.f32 %v1177_v49, %v1145_v44  ;;  %v985_v10 = vmul.f32 -0.5, %v1694_v18  ;;  %v988_v52 = vand.u32 2147483647, %v1694_v18  ;;  %vm2970_vm12 = vcmp.lt.f32.partialorder %v826_v60, 0.0004427343 }
  0xf0   :  { %v1008_v46 = vsel %vm2932_vm8, %v1005_v33, %v1002_v38 }
  0xf1   :  { %v1112_v28 = vadd.f32 %v1008_v46, %v856_v22  ;;  %v1209_v61 = vadd.f32 %v1193_v54, %v1161_v29  ;;  %v1696_v20 = vpop.eup %1695  ;;  %v986_v11 = vadd.f32 1.0, %v985_v10  ;;  %v813_v22 = vmax.f32 %v2875_v51, 0.0  ;;  %v1174_v54 = vld [vmem:[%s3041_s9 + $0x10] sm:$0xff] }
  0xf2   :  { %v993_v34 = vmul.f32 0.6931472, %v1696_v20  ;;  %v1698_v8 = vpop.eup %1697  ;;  %vm989_vm13 = vcmp.lt.f32.partialorder %v988_v52, 0.0004427343  ;;  %v853_v46 = vmax.f32 %v2925_v50, 0.0 }
  0xf3   :  { %v1128_v0 = vsel %vm872_vm9, %v2866_v63, %v1112_v28  ;;  %1506 = vmatpush.xpose.msk.msra.mxu0 %vm1419_vm2, %v1209_v61  ;;  %v982_v63 = vadd.f32 1.0, %v1694_v18  ;;  %v1700_v13 = vpop.eup %1699  ;;  %v822_v15 = vmul.f32 0.6931472, %v1698_v8  ;;  %v987_v26 = vmul.f32 %v1694_v18, %v986_v11 }
  0xf4   :  { %v1144_v58 = vadd.f32 1e-06, %v1128_v0  ;;  %v999_v3 = vsel %vm998_vm10, %v996_v12, %v993_v34  ;;  %v973_v59 = vadd.f32 1.0, %v1700_v13  ;;  %v1702_v36 = vpop.eup %1701  ;;  %v976_v2 = vmul.f32 -0.5, %v1700_v13 }
  0xf5   :  { %1703 = vlog2.f32 %v982_v63  ;;  %v1111_v62 = vadd.f32 %v999_v3, %v855_v24  ;;  %v964_v25 = vadd.f32 1.0, %v1702_v36  ;;  %v828_v30 = vsel %vm2970_vm12, %v825_v43, %v822_v15 }
  0xf6   :  { %v1192_v42 = vmul.f32 %v1176_v31, %v1144_v58  ;;  %1705 = vlog2.f32 %v973_v59  ;;  %v977_v47 = vadd.f32 1.0, %v976_v2  ;;  %v979_v40 = vand.u32 2147483647, %v1700_v13  ;;  %v1272_v59 = vpop.f32.mrf.mxu1 }
  0xf7   :  { %v1127_v37 = vsel %vm871_vm11, %v2885_v5, %v1111_v62  ;;  %v1159_v5 = vld [vmem:[%s3042_s7 + $0x18] sm:$0xff]  ;;  %1707 = vlog2.f32 %v964_v25  ;;  %v829_v44 = vadd.f32 %v828_v30, %v813_v22  ;;  %v967_v29 = vmul.f32 -0.5, %v1702_v36  ;;  %v1156_v62 = vld [vmem:[%s3042_s7] sm:$0xff] }
  0xf8   :  { %v1208_v39 = vadd.f32 %v1192_v42, %v1160_v17  ;;  %v1143_v9 = vadd.f32 1e-06, %v1127_v37  ;;  %v978_v38 = vmul.f32 %v1700_v13, %v977_v47  ;;  %vm980_vm15 = vcmp.lt.f32.partialorder %v979_v40, 0.0004427343  ;;  %v1173_v17 = vld [vmem:[%s3041_s9 + $0x8] sm:$0xff] }
  0xf9   :  { %v968_v28 = vadd.f32 1.0, %v967_v29  ;;  %v830_v31 = vsel %vm814_vm0, %v2875_v51, %v829_v44  ;;  %v852_v18 = vmax.f32 %v2946_v45, 0.0  ;;  %v833_v42 = vld [vmem:[%s3044_s6] sm:$0x1] }
  0xfa   :  { %1507 = vmatpush.xpose.msk.msra.mxu0 %vm1419_vm2, %v1208_v39  ;;  %v1191_v56 = vmul.f32 %v1175_v16, %v1143_v9  ;;  %v831_v63 = vadd.f32 1e-06, %v830_v31  ;;  %v1172_v39 = vld [vmem:[%s3041_s9] sm:$0xff]  ;;  %v1312_v16 = vpop.f32.mrf.mxu2  ;;  %v1332_v9 = vpop.f32.mrf.mxu3 }
  0xfb   :  { %v1704_v21 = vpop.eup %1703  ;;  %v969_v58 = vmul.f32 %v1702_v36, %v968_v28  ;;  %v832_v13 = vld [vmem:[%s3045_s4] sm:$0x1] }
  0xfc   :  { %v984_v33 = vmul.f32 0.6931472, %v1704_v21  ;;  %v1207_v35 = vadd.f32 %v1191_v56, %v1159_v5  ;;  %v1706_v4 = vpop.eup %1705  ;;  %v834_v3 = vmul.f32 %v833_v42, %v831_v63  ;;  %v1220_v30 = vld [vmem:[%s3046_s11] sm:$0x1] }
  0xfd   :  { %v975_v48 = vmul.f32 0.6931472, %v1706_v4  ;;  %v1708_v41 = vpop.eup %1707 }
  0xfe   :  { %v990_v49 = vsel %vm989_vm13, %v987_v26, %v984_v33  ;;  %1508 = vmatpush.xpose.msk.msra.mxu0 %vm1419_vm2, %v1207_v35  ;;  %v966_v0 = vmul.f32 0.6931472, %v1708_v41  ;;  %v835_v15 = vadd.f32 %v834_v3, %v832_v13  ;;  %v1292_v52 = vpop.f32.mrf.mxu1  ;;  %v1224_v35 = vand.u32 2147483647, %v1220_v30 }
  0xff   :  { %v1110_v14 = vadd.f32 %v990_v49, %v854_v32  ;;  %v981_v61 = vsel %vm980_vm15, %v978_v38, %v975_v48 }
 0x100   :  { %v1109_v55 = vadd.f32 %v981_v61, %v853_v46  ;;  %v1253_v43 = vperm.slane %v835_v15, 0  ;;  %v1225_v49 = vsub.f32 0.0, %v1224_v35  ;;  %v1221_v46 = vmax.f32 %v1220_v30, 0.0 }
 0x101   :  { %v1126_v27 = vsel %vm870_vm14, %v2910_v23, %v1110_v14  ;;  %v970_v23 = vand.u32 2147483647, %v1702_v36 }
 0x102   :  { %v1142_v7 = vadd.f32 1e-06, %v1126_v27  ;;  %v1125_v6 = vsel %vm869_vm1, %v2925_v50, %v1109_v55  ;;  %v1157_v50 = vld [vmem:[%s3042_s7 + $0x8] sm:$0xff]  ;;  %v1273_v37 = vadd.f32 %v1272_v59, %v1253_v43  ;;  %v1352_v11 = vpop.f32.mrf.mxu2  ;;  %v1226_v47 = vmul.f32 1.442695, %v1225_v49 }
 0x103   :  { %vm971_vm3 = vcmp.lt.f32.partialorder %v970_v23, 0.0004427343  ;;  %v1141_v20 = vadd.f32 1e-06, %v1125_v6  ;;  %v1240_v23 = vld [vmem:[%s3048_s10] sm:$0x1] }
 0x104   :  { %v1190_v53 = vmul.f32 %v1174_v54, %v1142_v7  ;;  %v972_v24 = vsel %vm971_vm3, %v969_v58, %v966_v0  ;;  %v1293_v36 = vadd.f32 %v1292_v52, %v1273_v37  ;;  %1709 = vpow2.f32 %v1226_v47 }
 0x105   :  { %v1108_v51 = vadd.f32 %v972_v24, %v852_v18  ;;  %v1189_v34 = vmul.f32 %v1173_v17, %v1141_v20 }
 0x106   :  { %v1206_v12 = vadd.f32 %v1190_v53, %v1158_v57  ;;  %v1313_v19 = vadd.f32 %v1312_v16, %v1293_v36  ;;  %v1241_v57 = vld [vmem:[%s3047_s12] sm:$0x1] }
 0x107   :  { %v1124_v1 = vsel %vm868_vm4, %v2946_v45, %v1108_v51  ;;  %v1205_v8 = vadd.f32 %v1189_v34, %v1157_v50 }
 0x108   :  { %1509 = vmatpush.xpose.msk.msra.mxu0 %vm1419_vm2, %v1206_v12  ;;  %v1140_v60 = vadd.f32 1e-06, %v1124_v1  ;;  %v1333_v21 = vadd.f32 %v1332_v9, %v1313_v19 }
 0x10a   :  { %v1188_v10 = vmul.f32 %v1172_v39, %v1140_v60  ;;  %v1353_v5 = vadd.f32 %v1352_v11, %v1333_v21  ;;  %v1710_v14 = vpop.eup %1709 }
 0x10b   :  { %v1228_v40 = vadd.f32 1.0, %v1710_v14  ;;  %v1231_v4 = vmul.f32 -0.5, %v1710_v14  ;;  %v1234_v29 = vand.u32 2147483647, %v1710_v14 }
 0x10c   :  { %1510 = vmatpush.xpose.msk.msra.mxu0 %vm1419_vm2, %v1205_v8  ;;  %v1204_v45 = vadd.f32 %v1188_v10, %v1156_v62 }
 0x10d   :  { %1711 = vlog2.f32 %v1228_v40  ;;  %v1232_v44 = vadd.f32 1.0, %v1231_v4  ;;  %vm1235_vm5 = vcmp.lt.f32.partialorder %v1234_v29, 0.0004427343 }
 0x10f   :  { %v1233_v54 = vmul.f32 %v1710_v14, %v1232_v44 }
 0x110   :  { %1511 = vmatpush.xpose.msk.msra.mxu0 %vm1419_vm2, %v1204_v45 }
 0x113   :  { %v1712_v38 = vpop.eup %1711 }
 0x114   :  { %v1230_v27 = vmul.f32 0.6931472, %v1712_v38 }
 0x116   :  { %v1236_v48 = vsel %vm1235_vm5, %v1233_v54, %v1230_v27 }
 0x117   :  { %v1237_v7 = vadd.f32 %v1236_v48, %v1221_v46 }
 0x123   :  { %v1372_v22 = vpop.f32.mrf.mxu1 }
 0x124   :  { %v1373_v32 = vadd.f32 %v1372_v22, %v1353_v5 }
 0x136   :  { %v1392_v25 = vpop.f32.mrf.mxu2 }
 0x137   :  { %v1393_v56 = vadd.f32 %v1392_v25, %v1373_v32 }
 0x139   :  { %v1412_v33 = vpop.f32.mrf.mxu3 }
 0x13a   :  { %v1413_v26 = vadd.f32 %v1412_v33, %v1393_v56 }
 0x13c   :  { %v1415_v2 = vmax.f32 %v1413_v26, 0.0 }
 0x13e   :  { %1512 = vmatmul.msk.f32.vlgmr.msra.gmra.mxu0 %vm1419_vm2, %v1415_v2  ;;  %vm1222_vm2 = vcmp.ne.f32.partialorder %v1220_v30, %v1220_v30 }
 0x13f   :  { %v1238_v28 = vsel %vm1222_vm2, %v1220_v30, %v1237_v7 }
 0x140   :  { %v1239_v41 = vadd.f32 1e-06, %v1238_v28 }
 0x142   :  { %v1242_v61 = vmul.f32 %v1241_v57, %v1239_v41 }
 0x144   :  { %v1243_v53 = vadd.f32 %v1242_v61, %v1240_v23 }
 0x146   :  { %v1417_v55 = vperm.slane %v1243_v53, 0 }
 0x1bb   :  { %v1488_v0 = vpop.f32.mrf.mxu0 }
 0x1bc   :  { %v1489_v31 = vadd.f32 %v1488_v0, %v1417_v55 }
 0x1be   :  { %1491 = vst [vmem:[%s3049_s13] sm:$0xff] %v1489_v31 }

</bundles_post_ra>
